<compile_context>
chip_gen: v7x
topology: tpu7x:2x2x1
jax: 0.10.0
libtpu: 0.0.40
codegen_flags: <defaults>
</compile_context>

<pallas_src>
import functools

import jax
import jax.numpy as jnp
from jax.experimental import pallas as pl
from jax.experimental.pallas import tpu as pltpu

# ----------------------- model hyperparameters (small) -----------------------
AVOCAB = 8                      # avocab.size()
MAX_POS = 8                     # MolGraph.MAX_POS
NBOND = 4                       # len(MolGraph.BOND_LIST)
ATOM_SIZE = AVOCAB + MAX_POS    # node_fdim
INPUT_SIZE = ATOM_SIZE + NBOND  # GRU input size
HIDDEN = 32
HIDDEN_PAD = 128                # lane-dense padded hidden size
DEPTH = 3

N_NODE = 16   # number of atoms    (row 0 = padding, masked out)
N_MESS = 16   # number of messages (row 0 = padding, masked out)
K_B = 4       # bgraph max neighbors
K_A = 6       # agraph max neighbors


# --------------------------------- kernel ------------------------------------
def _graph_encoder_kernel(depth,
                          x_ref, hnode_ref, G_ref, Asum_ref,
                          Wzx_ref, Wzh_ref, bz_ref,
                          Wrx_ref, Urw_ref, urb_ref,
                          Whx_ref, Whh_ref, bh_ref,
                          Won_ref, Woh_ref, bo_ref,
                          mmess_ref, mnode_ref,
                          out_ref):
    f32 = jnp.float32
    M = x_ref.shape[0]
    K = G_ref.shape[0] // M
    HP = out_ref.shape[1]

    x = x_ref[...]                        # bf16 [M, I]  message features (hmess)
    G = G_ref[...].astype(f32)            # [K*M, M] slot-major gather (row k*M+m -> bgraph[m,k])
    mmess = mmess_ref[...]                # [M, 1] f32 padding mask (row 0 = 0)

    # Loop-invariant input projections (bf16 MXU, f32 accumulate).  Identical to
    # the concatenated PyTorch Linear layers with W_z / W_h split into x / h parts.
    xz = jnp.dot(x, Wzx_ref[...], preferred_element_type=f32) + bz_ref[...].astype(f32)
    xr = jnp.dot(x, Wrx_ref[...], preferred_element_type=f32)            # W_r has no bias
    xh = jnp.dot(x, Whx_ref[...], preferred_element_type=f32) + bh_ref[...].astype(f32)

    # Recurrent-side weights: hoisted f32 upcast (h stays f32 for VPU/EUP math).
    Wzh = Wzh_ref[...].astype(f32)
    Urw = Urw_ref[...].astype(f32)
    urb = urb_ref[...].astype(f32)
    Whh = Whh_ref[...].astype(f32)

    h = jnp.zeros((M, HP), f32)
    for _ in range(depth):                # depth=3 -> keep unrolled
        # Gather all K neighbor slots at once: h_nei[k*M + m] = h[bgraph[m, k]].
        h_nei = jnp.dot(G, h, preferred_element_type=f32)                # [K*M, HP]
        u_nei = jnp.dot(h_nei, Urw, preferred_element_type=f32) + urb    # U_r(h_nei)

        # Segmented neighbor sums over K contiguous, tile-aligned [M, HP] slabs.
        # (Replaces the old EexpT one-hot matmuls; xr broadcast replaces Eexp.)
        sum_h = jnp.zeros((M, HP), f32)
        sum_gated = jnp.zeros((M, HP), f32)
        for k in range(K):
            h_k = h_nei[k * M:(k + 1) * M]
            r_k = jax.nn.sigmoid(xr + u_nei[k * M:(k + 1) * M])
            sum_h = sum_h + h_k
            sum_gated = sum_gated + r_k * h_k

        z = jax.nn.sigmoid(xz + jnp.dot(sum_h, Wzh, preferred_element_type=f32))
        pre_h = jnp.tanh(xh + jnp.dot(sum_gated, Whh, preferred_element_type=f32))
        h = ((1.0 - z) * sum_h + z * pre_h) * mmess                      # mask kills padding msg

    # MPNEncoder tail: aggregate messages per node, W_o + ReLU, node mask.
    nei_msg = jnp.dot(Asum_ref[...].astype(f32), h, preferred_element_type=f32)   # [N, HP]
    node_h = (jnp.dot(hnode_ref[...], Won_ref[...], preferred_element_type=f32)
              + jnp.dot(nei_msg, Woh_ref[...].astype(f32), preferred_element_type=f32)
              + bo_ref[...].astype(f32))
    out_ref[...] = jnp.maximum(node_h, 0.0) * mnode_ref[...]


# --------------------------- operand construction -----------------------------
def build_graph_operands(graph_tensors):
    """embed_graph + structural matrices.  Pure glue; hoist/cache across calls
    when the molecule set is reused (these are the largest inputs by bytes)."""
    fnode, fmess, agraph, bgraph, _ = graph_tensors
    bf16 = jnp.bfloat16

    fnode1 = jax.nn.one_hot(fnode[:, 0], AVOCAB, dtype=jnp.float32)
    fnode2 = jax.nn.one_hot(fnode[:, 1], MAX_POS, dtype=jnp.float32)
    hnode = jnp.concatenate([fnode1, fnode2], axis=-1)                   # [N, atom_size]
    fmess1 = hnode[fmess[:, 0]]
    fmess2 = jax.nn.one_hot(fmess[:, 2], NBOND, dtype=jnp.float32)
    hmess = jnp.concatenate([fmess1, fmess2], axis=-1)                   # [M, input_size]

    M, N = hmess.shape[0], hnode.shape[0]

    # Slot-major gather matrix: row k*M + m is one-hot of bgraph[m, k]. bf16 is exact (0/1).
    G = jax.nn.one_hot(bgraph.T.reshape(-1), M, dtype=bf16)              # [K*M, M]
    # Per-node message aggregation (sum of one-hots over agraph columns). Small-int exact in bf16.
    Asum = jax.nn.one_hot(agraph, M, dtype=jnp.float32).sum(axis=1).astype(bf16)   # [N, M]

    mmess = jnp.ones((M, 1), jnp.float32).at[0, 0].set(0.0)
    mnode = jnp.ones((N, 1), jnp.float32).at[0, 0].set(0.0)
    return hmess.astype(bf16), hnode.astype(bf16), G, Asum, mmess, mnode


def pad_params_bf16(params, hp=HIDDEN_PAD):
    """Zero-pad hidden dim to HP (lane-dense) and store weights as bf16.
    Padded lanes stay exactly 0 through the GRU, sliced off in the wrapper."""
    bf16 = jnp.bfloat16
    h = params["bz"].shape[-1]

    def padh(w):   # pad trailing (hidden/output) dim
        return jnp.pad(w, [(0, 0)] * (w.ndim - 1) + [(0, hp - h)]).astype(bf16)

    def padhh(w):  # pad [H, H] -> [HP, HP]
        return jnp.pad(w, [(0, hp - h), (0, hp - h)]).astype(bf16)

    p = params
    return dict(
        Wzx=padh(p["Wzx"]), Wzh=padhh(p["Wzh"]), bz=padh(p["bz"]),
        Wrx=padh(p["Wrx"]), Urw=padhh(p["Urw"]), urb=padh(p["urb"]),
        Whx=padh(p["Whx"]), Whh=padhh(p["Whh"]), bh=padh(p["bh"]),
        Won=padh(p["Won"]), Woh=padhh(p["Woh"]), bo=padh(p["bo"]),
    )


# --------------------------------- wrapper -----------------------------------
def graph_encoder_forward(graph_tensors, params, depth=DEPTH):
    hmess, hnode, G, Asum, mmess, mnode = build_graph_operands(graph_tensors)
    pp = pad_params_bf16(params)
    N = hnode.shape[0]
    H = params["bz"].shape[-1]
    HP = HIDDEN_PAD

    inputs = (hmess, hnode, G, Asum,
              pp["Wzx"], pp["Wzh"], pp["bz"],
              pp["Wrx"], pp["Urw"], pp["urb"],
              pp["Whx"], pp["Whh"], pp["bh"],
              pp["Won"], pp["Woh"], pp["bo"],
              mmess, mnode)

    def full_spec(a):
        nd = a.ndim
        return pl.BlockSpec(a.shape, lambda i, nd=nd: (0,) * nd)

    kernel = functools.partial(_graph_encoder_kernel, depth)
    out = pl.pallas_call(
        kernel,
        grid=(1,),
        in_specs=[full_spec(a) for a in inputs],
        out_specs=pl.BlockSpec((N, HP), lambda i: (0, 0)),
        out_shape=jax.ShapeDtypeStruct((N, HP), jnp.float32),
        compiler_params=pltpu.CompilerParams(
            dimension_semantics=("arbitrary",),
            vmem_limit_bytes=32 * 1024 * 1024),   # sized for v7x's smaller VMEM too
    )(*inputs)
    return out[:, :H]                             # drop lane padding


# ---------------------------- parameter creation ------------------------------
def init_params(key):
    I, H, A = INPUT_SIZE, HIDDEN, ATOM_SIZE
    ks = jax.random.split(key, 9)

    def lin(k, fan_in, fan_out):
        bound = 1.0 / jnp.sqrt(jnp.float32(fan_in))
        w = jax.random.uniform(k, (fan_in, fan_out), jnp.float32, -bound, bound)
        # Weights are stored in bf16; keep the canonical (reference) copy as the
        # bf16-rounded value so kernel and reference use identical parameters.
        return w.astype(jnp.bfloat16).astype(jnp.float32)

    Wz = lin(ks[0], I + H, H)   # W_z : Linear(I+H, H)
    Wh = lin(ks[1], I + H, H)   # W_h : Linear(I+H, H)
    Wo = lin(ks[2], A + H, H)   # W_o : Linear(A+H, H)
    return dict(
        Wzx=Wz[:I], Wzh=Wz[I:], bz=lin(ks[3], 1, H),
        Wrx=lin(ks[4], I, H),                       # W_r: no bias
        Urw=lin(ks[5], H, H), urb=lin(ks[6], 1, H),
        Whx=Wh[:I], Whh=Wh[I:], bh=lin(ks[7], 1, H),
        Won=Wo[:A], Woh=Wo[A:], bo=lin(ks[8], 1, H),
    )


# ------------------------------ pure-JAX reference ----------------------------
def reference_forward(graph_tensors, params, depth=DEPTH):
    with jax.default_matmul_precision("float32"):
        fnode, fmess, agraph, bgraph, _ = graph_tensors
        fnode1 = jax.nn.one_hot(fnode[:, 0], AVOCAB)
        fnode2 = jax.nn.one_hot(fnode[:, 1], MAX_POS)
        hnode = jnp.concatenate([fnode1, fnode2], -1)
        fmess1 = hnode[fmess[:, 0]]
        fmess2 = jax.nn.one_hot(fmess[:, 2], NBOND)
        x = jnp.concatenate([fmess1, fmess2], -1)
        M, N, H = x.shape[0], hnode.shape[0], HIDDEN
        p = params
        mmess = jnp.ones((M, 1)).at[0, 0].set(0.0)
        mnode = jnp.ones((N, 1)).at[0, 0].set(0.0)
        h = jnp.zeros((M, H), jnp.float32)
        for _ in range(depth):
            h_nei = h[bgraph]                              # [M, K, H]
            sum_h = h_nei.sum(1)
            z = jax.nn.sigmoid(x @ p["Wzx"] + sum_h @ p["Wzh"] + p["bz"])
            r1 = (x @ p["Wrx"])[:, None, :]
            r2 = h_nei @ p["Urw"] + p["urb"]
            r = jax.nn.sigmoid(r1 + r2)
            sum_g = (r * h_nei).sum(1)
            pre_h = jnp.tanh(x @ p["Whx"] + sum_g @ p["Whh"] + p["bh"])
            h = ((1.0 - z) * sum_h + z * pre_h) * mmess
        nei = h[agraph].sum(1)
        return jax.nn.relu(hnode @ p["Won"] + nei @ p["Woh"] + p["bo"]) * mnode


# ----------------------------------- main -------------------------------------
if __name__ == "__main__":
    key = jax.random.PRNGKey(0)
    kp, k1, k2, k3, k4, k5 = jax.random.split(key, 6)
    params = init_params(kp)

    # Synthetic graph tensors (row 0 of nodes/messages is the padding entry).
    fnode = jnp.stack([jax.random.randint(k1, (N_NODE,), 0, AVOCAB),
                       jax.random.randint(k2, (N_NODE,), 0, MAX_POS)], axis=1)
    fmess_src = jax.random.randint(k3, (N_MESS,), 0, N_NODE)
    fmess_bond = jax.random.randint(k4, (N_MESS,), 0, NBOND)
    fmess = jnp.stack([fmess_src, fmess_src, fmess_bond], axis=1)
    k5a, k5b = jax.random.split(k5)
    agraph = jax.random.randint(k5a, (N_NODE, K_A), 0, N_MESS)
    bgraph = jax.random.randint(k5b, (N_MESS, K_B), 0, N_MESS)
    graph_tensors = (fnode, fmess, agraph, bgraph, None)

    out = graph_encoder_forward(graph_tensors, params)
    out = jax.block_until_ready(out)

    ref = reference_forward(graph_tensors, params)
    assert out.shape == (N_NODE, HIDDEN)
    assert jnp.allclose(out, ref, atol=2e-3, rtol=2e-3), "mismatch vs pure-JAX reference"
    print("KERNEL_OK")
</pallas_src>

<mosaic_0001>
module attributes {stable_mosaic.version = 11 : i64} {
  func.func @_graph_encoder_kernel(%arg0: i32, %arg1: memref<16x20xbf16, #tpu.memory_space<vmem>>, %arg2: memref<16x16xbf16, #tpu.memory_space<vmem>>, %arg3: memref<64x16xbf16, #tpu.memory_space<vmem>>, %arg4: memref<16x16xbf16, #tpu.memory_space<vmem>>, %arg5: memref<20x128xbf16, #tpu.memory_space<vmem>>, %arg6: memref<128x128xbf16, #tpu.memory_space<vmem>>, %arg7: memref<1x128xbf16, #tpu.memory_space<vmem>>, %arg8: memref<20x128xbf16, #tpu.memory_space<vmem>>, %arg9: memref<128x128xbf16, #tpu.memory_space<vmem>>, %arg10: memref<1x128xbf16, #tpu.memory_space<vmem>>, %arg11: memref<20x128xbf16, #tpu.memory_space<vmem>>, %arg12: memref<128x128xbf16, #tpu.memory_space<vmem>>, %arg13: memref<1x128xbf16, #tpu.memory_space<vmem>>, %arg14: memref<16x128xbf16, #tpu.memory_space<vmem>>, %arg15: memref<128x128xbf16, #tpu.memory_space<vmem>>, %arg16: memref<1x128xbf16, #tpu.memory_space<vmem>>, %arg17: memref<16x1xf32, #tpu.memory_space<vmem>>, %arg18: memref<16x1xf32, #tpu.memory_space<vmem>>, %arg19: memref<16x128xf32, #tpu.memory_space<vmem>>) attributes {dimension_semantics = [#tpu.dimension_semantics<arbitrary>], iteration_bounds = array<i64: 1>, scalar_prefetch = 0 : i64, scratch_operands = 0 : i64, tpu.core_type = #tpu.core_type<tc>, window_params = [{pipeline_mode = #tpu.pipeline_mode<synchronous>, transform_indices = @transform_0, window_bounds = array<i64: 16, 20>}, {pipeline_mode = #tpu.pipeline_mode<synchronous>, transform_indices = @transform_1, window_bounds = array<i64: 16, 16>}, {pipeline_mode = #tpu.pipeline_mode<synchronous>, transform_indices = @transform_2, window_bounds = array<i64: 64, 16>}, {pipeline_mode = #tpu.pipeline_mode<synchronous>, transform_indices = @transform_3, window_bounds = array<i64: 16, 16>}, {pipeline_mode = #tpu.pipeline_mode<synchronous>, transform_indices = @transform_4, window_bounds = array<i64: 20, 128>}, {pipeline_mode = #tpu.pipeline_mode<synchronous>, transform_indices = @transform_5, window_bounds = array<i64: 128, 128>}, {pipeline_mode = #tpu.pipeline_mode<synchronous>, transform_indices = @transform_6, window_bounds = array<i64: 1, 128>}, {pipeline_mode = #tpu.pipeline_mode<synchronous>, transform_indices = @transform_7, window_bounds = array<i64: 20, 128>}, {pipeline_mode = #tpu.pipeline_mode<synchronous>, transform_indices = @transform_8, window_bounds = array<i64: 128, 128>}, {pipeline_mode = #tpu.pipeline_mode<synchronous>, transform_indices = @transform_9, window_bounds = array<i64: 1, 128>}, {pipeline_mode = #tpu.pipeline_mode<synchronous>, transform_indices = @transform_10, window_bounds = array<i64: 20, 128>}, {pipeline_mode = #tpu.pipeline_mode<synchronous>, transform_indices = @transform_11, window_bounds = array<i64: 128, 128>}, {pipeline_mode = #tpu.pipeline_mode<synchronous>, transform_indices = @transform_12, window_bounds = array<i64: 1, 128>}, {pipeline_mode = #tpu.pipeline_mode<synchronous>, transform_indices = @transform_13, window_bounds = array<i64: 16, 128>}, {pipeline_mode = #tpu.pipeline_mode<synchronous>, transform_indices = @transform_14, window_bounds = array<i64: 128, 128>}, {pipeline_mode = #tpu.pipeline_mode<synchronous>, transform_indices = @transform_15, window_bounds = array<i64: 1, 128>}, {pipeline_mode = #tpu.pipeline_mode<synchronous>, transform_indices = @transform_16, window_bounds = array<i64: 16, 1>}, {pipeline_mode = #tpu.pipeline_mode<synchronous>, transform_indices = @transform_17, window_bounds = array<i64: 16, 1>}, {pipeline_mode = #tpu.pipeline_mode<synchronous>, transform_indices = @transform_18, window_bounds = array<i64: 16, 128>}]} {
    %c0 = arith.constant 0 : index
    %c0_0 = arith.constant 0 : index
    %0 = vector.load %arg1[%c0, %c0_0] : memref<16x20xbf16, #tpu.memory_space<vmem>>, vector<16x20xbf16>
    %c0_1 = arith.constant 0 : index
    %c0_2 = arith.constant 0 : index
    %1 = vector.load %arg3[%c0_1, %c0_2] : memref<64x16xbf16, #tpu.memory_space<vmem>>, vector<64x16xbf16>
    %2 = arith.extf %1 : vector<64x16xbf16> to vector<64x16xf32>
    %c0_3 = arith.constant 0 : index
    %c0_4 = arith.constant 0 : index
    %3 = vector.load %arg17[%c0_3, %c0_4] : memref<16x1xf32, #tpu.memory_space<vmem>>, vector<16x1xf32>
    %c0_5 = arith.constant 0 : index
    %c0_6 = arith.constant 0 : index
    %4 = vector.load %arg5[%c0_5, %c0_6] : memref<20x128xbf16, #tpu.memory_space<vmem>>, vector<20x128xbf16>
    %cst = arith.constant dense<0.000000e+00> : vector<16x128xf32>
    %5 = tpu.matmul %0, %4, %cst {dimension_numbers = #tpu.dot_dimension_numbers<[1], [0], [0], [1], [0, 0, 1, 1], [], []>} : vector<16x20xbf16>, vector<20x128xbf16>, vector<16x128xf32> -> vector<16x128xf32>
    %c0_7 = arith.constant 0 : index
    %c0_8 = arith.constant 0 : index
    %6 = vector.load %arg7[%c0_7, %c0_8] : memref<1x128xbf16, #tpu.memory_space<vmem>>, vector<1x128xbf16>
    %7 = arith.extf %6 : vector<1x128xbf16> to vector<1x128xf32>
    %8 = vector.broadcast %7 : vector<1x128xf32> to vector<16x128xf32>
    %9 = arith.addf %5, %8 : vector<16x128xf32>
    %c0_9 = arith.constant 0 : index
    %c0_10 = arith.constant 0 : index
    %10 = vector.load %arg8[%c0_9, %c0_10] : memref<20x128xbf16, #tpu.memory_space<vmem>>, vector<20x128xbf16>
    %cst_11 = arith.constant dense<0.000000e+00> : vector<16x128xf32>
    %11 = tpu.matmul %0, %10, %cst_11 {dimension_numbers = #tpu.dot_dimension_numbers<[1], [0], [0], [1], [0, 0, 1, 1], [], []>} : vector<16x20xbf16>, vector<20x128xbf16>, vector<16x128xf32> -> vector<16x128xf32>
    %c0_12 = arith.constant 0 : index
    %c0_13 = arith.constant 0 : index
    %12 = vector.load %arg11[%c0_12, %c0_13] : memref<20x128xbf16, #tpu.memory_space<vmem>>, vector<20x128xbf16>
    %cst_14 = arith.constant dense<0.000000e+00> : vector<16x128xf32>
    %13 = tpu.matmul %0, %12, %cst_14 {dimension_numbers = #tpu.dot_dimension_numbers<[1], [0], [0], [1], [0, 0, 1, 1], [], []>} : vector<16x20xbf16>, vector<20x128xbf16>, vector<16x128xf32> -> vector<16x128xf32>
    %c0_15 = arith.constant 0 : index
    %c0_16 = arith.constant 0 : index
    %14 = vector.load %arg13[%c0_15, %c0_16] : memref<1x128xbf16, #tpu.memory_space<vmem>>, vector<1x128xbf16>
    %15 = arith.extf %14 : vector<1x128xbf16> to vector<1x128xf32>
    %16 = vector.broadcast %15 : vector<1x128xf32> to vector<16x128xf32>
    %17 = arith.addf %13, %16 : vector<16x128xf32>
    %c0_17 = arith.constant 0 : index
    %c0_18 = arith.constant 0 : index
    %18 = vector.load %arg6[%c0_17, %c0_18] : memref<128x128xbf16, #tpu.memory_space<vmem>>, vector<128x128xbf16>
    %19 = arith.extf %18 : vector<128x128xbf16> to vector<128x128xf32>
    %c0_19 = arith.constant 0 : index
    %c0_20 = arith.constant 0 : index
    %20 = vector.load %arg9[%c0_19, %c0_20] : memref<128x128xbf16, #tpu.memory_space<vmem>>, vector<128x128xbf16>
    %21 = arith.extf %20 : vector<128x128xbf16> to vector<128x128xf32>
    %c0_21 = arith.constant 0 : index
    %c0_22 = arith.constant 0 : index
    %22 = vector.load %arg10[%c0_21, %c0_22] : memref<1x128xbf16, #tpu.memory_space<vmem>>, vector<1x128xbf16>
    %23 = arith.extf %22 : vector<1x128xbf16> to vector<1x128xf32>
    %c0_23 = arith.constant 0 : index
    %c0_24 = arith.constant 0 : index
    %24 = vector.load %arg12[%c0_23, %c0_24] : memref<128x128xbf16, #tpu.memory_space<vmem>>, vector<128x128xbf16>
    %25 = arith.extf %24 : vector<128x128xbf16> to vector<128x128xf32>
    %cst_25 = arith.constant 0.000000e+00 : f32
    %26 = vector.broadcast %cst_25 : f32 to vector<16x128xf32>
    %cst_26 = arith.constant dense<0.000000e+00> : vector<64x128xf32>
    %27 = tpu.matmul %2, %26, %cst_26 {dimension_numbers = #tpu.dot_dimension_numbers<[1], [0], [0], [1], [0, 0, 1, 1], [], []>} : vector<64x16xf32>, vector<16x128xf32>, vector<64x128xf32> -> vector<64x128xf32>
    %cst_27 = arith.constant dense<0.000000e+00> : vector<64x128xf32>
    %28 = tpu.matmul %27, %21, %cst_27 {dimension_numbers = #tpu.dot_dimension_numbers<[1], [0], [0], [1], [0, 0, 1, 1], [], []>} : vector<64x128xf32>, vector<128x128xf32>, vector<64x128xf32> -> vector<64x128xf32>
    %29 = vector.broadcast %23 : vector<1x128xf32> to vector<64x128xf32>
    %30 = arith.addf %28, %29 : vector<64x128xf32>
    %cst_28 = arith.constant 0.000000e+00 : f32
    %31 = vector.broadcast %cst_28 : f32 to vector<16x128xf32>
    %cst_29 = arith.constant 0.000000e+00 : f32
    %32 = vector.broadcast %cst_29 : f32 to vector<16x128xf32>
    %33 = vector.extract_strided_slice %27 {offsets = [0, 0], sizes = [16, 128], strides = [1, 1]} : vector<64x128xf32> to vector<16x128xf32>
    %34 = vector.extract_strided_slice %30 {offsets = [0, 0], sizes = [16, 128], strides = [1, 1]} : vector<64x128xf32> to vector<16x128xf32>
    %35 = arith.addf %11, %34 : vector<16x128xf32>
    %36 = arith.negf %35 : vector<16x128xf32>
    %37 = math.exp %36 : vector<16x128xf32>
    %cst_30 = arith.constant 1.000000e+00 : f32
    %38 = vector.broadcast %cst_30 : f32 to vector<16x128xf32>
    %39 = arith.addf %38, %37 : vector<16x128xf32>
    %40 = arith.divf %38, %39 : vector<16x128xf32>
    %41 = arith.addf %31, %33 : vector<16x128xf32>
    %42 = arith.mulf %40, %33 : vector<16x128xf32>
    %43 = arith.addf %32, %42 : vector<16x128xf32>
    %44 = vector.extract_strided_slice %27 {offsets = [16, 0], sizes = [16, 128], strides = [1, 1]} : vector<64x128xf32> to vector<16x128xf32>
    %45 = vector.extract_strided_slice %30 {offsets = [16, 0], sizes = [16, 128], strides = [1, 1]} : vector<64x128xf32> to vector<16x128xf32>
    %46 = arith.addf %11, %45 : vector<16x128xf32>
    %47 = arith.negf %46 : vector<16x128xf32>
    %48 = math.exp %47 : vector<16x128xf32>
    %cst_31 = arith.constant 1.000000e+00 : f32
    %49 = vector.broadcast %cst_31 : f32 to vector<16x128xf32>
    %50 = arith.addf %49, %48 : vector<16x128xf32>
    %51 = arith.divf %49, %50 : vector<16x128xf32>
    %52 = arith.addf %41, %44 : vector<16x128xf32>
    %53 = arith.mulf %51, %44 : vector<16x128xf32>
    %54 = arith.addf %43, %53 : vector<16x128xf32>
    %55 = vector.extract_strided_slice %27 {offsets = [32, 0], sizes = [16, 128], strides = [1, 1]} : vector<64x128xf32> to vector<16x128xf32>
    %56 = vector.extract_strided_slice %30 {offsets = [32, 0], sizes = [16, 128], strides = [1, 1]} : vector<64x128xf32> to vector<16x128xf32>
    %57 = arith.addf %11, %56 : vector<16x128xf32>
    %58 = arith.negf %57 : vector<16x128xf32>
    %59 = math.exp %58 : vector<16x128xf32>
    %cst_32 = arith.constant 1.000000e+00 : f32
    %60 = vector.broadcast %cst_32 : f32 to vector<16x128xf32>
    %61 = arith.addf %60, %59 : vector<16x128xf32>
    %62 = arith.divf %60, %61 : vector<16x128xf32>
    %63 = arith.addf %52, %55 : vector<16x128xf32>
    %64 = arith.mulf %62, %55 : vector<16x128xf32>
    %65 = arith.addf %54, %64 : vector<16x128xf32>
    %66 = vector.extract_strided_slice %27 {offsets = [48, 0], sizes = [16, 128], strides = [1, 1]} : vector<64x128xf32> to vector<16x128xf32>
    %67 = vector.extract_strided_slice %30 {offsets = [48, 0], sizes = [16, 128], strides = [1, 1]} : vector<64x128xf32> to vector<16x128xf32>
    %68 = arith.addf %11, %67 : vector<16x128xf32>
    %69 = arith.negf %68 : vector<16x128xf32>
    %70 = math.exp %69 : vector<16x128xf32>
    %cst_33 = arith.constant 1.000000e+00 : f32
    %71 = vector.broadcast %cst_33 : f32 to vector<16x128xf32>
    %72 = arith.addf %71, %70 : vector<16x128xf32>
    %73 = arith.divf %71, %72 : vector<16x128xf32>
    %74 = arith.addf %63, %66 : vector<16x128xf32>
    %75 = arith.mulf %73, %66 : vector<16x128xf32>
    %76 = arith.addf %65, %75 : vector<16x128xf32>
    %cst_34 = arith.constant dense<0.000000e+00> : vector<16x128xf32>
    %77 = tpu.matmul %74, %19, %cst_34 {dimension_numbers = #tpu.dot_dimension_numbers<[1], [0], [0], [1], [0, 0, 1, 1], [], []>} : vector<16x128xf32>, vector<128x128xf32>, vector<16x128xf32> -> vector<16x128xf32>
    %78 = arith.addf %9, %77 : vector<16x128xf32>
    %79 = arith.negf %78 : vector<16x128xf32>
    %80 = math.exp %79 : vector<16x128xf32>
    %cst_35 = arith.constant 1.000000e+00 : f32
    %81 = vector.broadcast %cst_35 : f32 to vector<16x128xf32>
    %82 = arith.addf %81, %80 : vector<16x128xf32>
    %83 = arith.divf %81, %82 : vector<16x128xf32>
    %cst_36 = arith.constant dense<0.000000e+00> : vector<16x128xf32>
    %84 = tpu.matmul %76, %25, %cst_36 {dimension_numbers = #tpu.dot_dimension_numbers<[1], [0], [0], [1], [0, 0, 1, 1], [], []>} : vector<16x128xf32>, vector<128x128xf32>, vector<16x128xf32> -> vector<16x128xf32>
    %85 = arith.addf %17, %84 : vector<16x128xf32>
    %86 = math.tanh %85 : vector<16x128xf32>
    %cst_37 = arith.constant 1.000000e+00 : f32
    %87 = vector.broadcast %cst_37 : f32 to vector<16x128xf32>
    %88 = arith.subf %87, %83 : vector<16x128xf32>
    %89 = arith.mulf %88, %74 : vector<16x128xf32>
    %90 = arith.mulf %83, %86 : vector<16x128xf32>
    %91 = arith.addf %89, %90 : vector<16x128xf32>
    %92 = vector.broadcast %3 : vector<16x1xf32> to vector<16x128xf32>
    %93 = arith.mulf %91, %92 : vector<16x128xf32>
    %cst_38 = arith.constant dense<0.000000e+00> : vector<64x128xf32>
    %94 = tpu.matmul %2, %93, %cst_38 {dimension_numbers = #tpu.dot_dimension_numbers<[1], [0], [0], [1], [0, 0, 1, 1], [], []>} : vector<64x16xf32>, vector<16x128xf32>, vector<64x128xf32> -> vector<64x128xf32>
    %cst_39 = arith.constant dense<0.000000e+00> : vector<64x128xf32>
    %95 = tpu.matmul %94, %21, %cst_39 {dimension_numbers = #tpu.dot_dimension_numbers<[1], [0], [0], [1], [0, 0, 1, 1], [], []>} : vector<64x128xf32>, vector<128x128xf32>, vector<64x128xf32> -> vector<64x128xf32>
    %96 = vector.broadcast %23 : vector<1x128xf32> to vector<64x128xf32>
    %97 = arith.addf %95, %96 : vector<64x128xf32>
    %cst_40 = arith.constant 0.000000e+00 : f32
    %98 = vector.broadcast %cst_40 : f32 to vector<16x128xf32>
    %cst_41 = arith.constant 0.000000e+00 : f32
    %99 = vector.broadcast %cst_41 : f32 to vector<16x128xf32>
    %100 = vector.extract_strided_slice %94 {offsets = [0, 0], sizes = [16, 128], strides = [1, 1]} : vector<64x128xf32> to vector<16x128xf32>
    %101 = vector.extract_strided_slice %97 {offsets = [0, 0], sizes = [16, 128], strides = [1, 1]} : vector<64x128xf32> to vector<16x128xf32>
    %102 = arith.addf %11, %101 : vector<16x128xf32>
    %103 = arith.negf %102 : vector<16x128xf32>
    %104 = math.exp %103 : vector<16x128xf32>
    %cst_42 = arith.constant 1.000000e+00 : f32
    %105 = vector.broadcast %cst_42 : f32 to vector<16x128xf32>
    %106 = arith.addf %105, %104 : vector<16x128xf32>
    %107 = arith.divf %105, %106 : vector<16x128xf32>
    %108 = arith.addf %98, %100 : vector<16x128xf32>
    %109 = arith.mulf %107, %100 : vector<16x128xf32>
    %110 = arith.addf %99, %109 : vector<16x128xf32>
    %111 = vector.extract_strided_slice %94 {offsets = [16, 0], sizes = [16, 128], strides = [1, 1]} : vector<64x128xf32> to vector<16x128xf32>
    %112 = vector.extract_strided_slice %97 {offsets = [16, 0], sizes = [16, 128], strides = [1, 1]} : vector<64x128xf32> to vector<16x128xf32>
    %113 = arith.addf %11, %112 : vector<16x128xf32>
    %114 = arith.negf %113 : vector<16x128xf32>
    %115 = math.exp %114 : vector<16x128xf32>
    %cst_43 = arith.constant 1.000000e+00 : f32
    %116 = vector.broadcast %cst_43 : f32 to vector<16x128xf32>
    %117 = arith.addf %116, %115 : vector<16x128xf32>
    %118 = arith.divf %116, %117 : vector<16x128xf32>
    %119 = arith.addf %108, %111 : vector<16x128xf32>
    %120 = arith.mulf %118, %111 : vector<16x128xf32>
    %121 = arith.addf %110, %120 : vector<16x128xf32>
    %122 = vector.extract_strided_slice %94 {offsets = [32, 0], sizes = [16, 128], strides = [1, 1]} : vector<64x128xf32> to vector<16x128xf32>
    %123 = vector.extract_strided_slice %97 {offsets = [32, 0], sizes = [16, 128], strides = [1, 1]} : vector<64x128xf32> to vector<16x128xf32>
    %124 = arith.addf %11, %123 : vector<16x128xf32>
    %125 = arith.negf %124 : vector<16x128xf32>
    %126 = math.exp %125 : vector<16x128xf32>
    %cst_44 = arith.constant 1.000000e+00 : f32
    %127 = vector.broadcast %cst_44 : f32 to vector<16x128xf32>
    %128 = arith.addf %127, %126 : vector<16x128xf32>
    %129 = arith.divf %127, %128 : vector<16x128xf32>
    %130 = arith.addf %119, %122 : vector<16x128xf32>
    %131 = arith.mulf %129, %122 : vector<16x128xf32>
    %132 = arith.addf %121, %131 : vector<16x128xf32>
    %133 = vector.extract_strided_slice %94 {offsets = [48, 0], sizes = [16, 128], strides = [1, 1]} : vector<64x128xf32> to vector<16x128xf32>
    %134 = vector.extract_strided_slice %97 {offsets = [48, 0], sizes = [16, 128], strides = [1, 1]} : vector<64x128xf32> to vector<16x128xf32>
    %135 = arith.addf %11, %134 : vector<16x128xf32>
    %136 = arith.negf %135 : vector<16x128xf32>
    %137 = math.exp %136 : vector<16x128xf32>
    %cst_45 = arith.constant 1.000000e+00 : f32
    %138 = vector.broadcast %cst_45 : f32 to vector<16x128xf32>
    %139 = arith.addf %138, %137 : vector<16x128xf32>
    %140 = arith.divf %138, %139 : vector<16x128xf32>
    %141 = arith.addf %130, %133 : vector<16x128xf32>
    %142 = arith.mulf %140, %133 : vector<16x128xf32>
    %143 = arith.addf %132, %142 : vector<16x128xf32>
    %cst_46 = arith.constant dense<0.000000e+00> : vector<16x128xf32>
    %144 = tpu.matmul %141, %19, %cst_46 {dimension_numbers = #tpu.dot_dimension_numbers<[1], [0], [0], [1], [0, 0, 1, 1], [], []>} : vector<16x128xf32>, vector<128x128xf32>, vector<16x128xf32> -> vector<16x128xf32>
    %145 = arith.addf %9, %144 : vector<16x128xf32>
    %146 = arith.negf %145 : vector<16x128xf32>
    %147 = math.exp %146 : vector<16x128xf32>
    %cst_47 = arith.constant 1.000000e+00 : f32
    %148 = vector.broadcast %cst_47 : f32 to vector<16x128xf32>
    %149 = arith.addf %148, %147 : vector<16x128xf32>
    %150 = arith.divf %148, %149 : vector<16x128xf32>
    %cst_48 = arith.constant dense<0.000000e+00> : vector<16x128xf32>
    %151 = tpu.matmul %143, %25, %cst_48 {dimension_numbers = #tpu.dot_dimension_numbers<[1], [0], [0], [1], [0, 0, 1, 1], [], []>} : vector<16x128xf32>, vector<128x128xf32>, vector<16x128xf32> -> vector<16x128xf32>
    %152 = arith.addf %17, %151 : vector<16x128xf32>
    %153 = math.tanh %152 : vector<16x128xf32>
    %cst_49 = arith.constant 1.000000e+00 : f32
    %154 = vector.broadcast %cst_49 : f32 to vector<16x128xf32>
    %155 = arith.subf %154, %150 : vector<16x128xf32>
    %156 = arith.mulf %155, %141 : vector<16x128xf32>
    %157 = arith.mulf %150, %153 : vector<16x128xf32>
    %158 = arith.addf %156, %157 : vector<16x128xf32>
    %159 = vector.broadcast %3 : vector<16x1xf32> to vector<16x128xf32>
    %160 = arith.mulf %158, %159 : vector<16x128xf32>
    %cst_50 = arith.constant dense<0.000000e+00> : vector<64x128xf32>
    %161 = tpu.matmul %2, %160, %cst_50 {dimension_numbers = #tpu.dot_dimension_numbers<[1], [0], [0], [1], [0, 0, 1, 1], [], []>} : vector<64x16xf32>, vector<16x128xf32>, vector<64x128xf32> -> vector<64x128xf32>
    %cst_51 = arith.constant dense<0.000000e+00> : vector<64x128xf32>
    %162 = tpu.matmul %161, %21, %cst_51 {dimension_numbers = #tpu.dot_dimension_numbers<[1], [0], [0], [1], [0, 0, 1, 1], [], []>} : vector<64x128xf32>, vector<128x128xf32>, vector<64x128xf32> -> vector<64x128xf32>
    %163 = vector.broadcast %23 : vector<1x128xf32> to vector<64x128xf32>
    %164 = arith.addf %162, %163 : vector<64x128xf32>
    %cst_52 = arith.constant 0.000000e+00 : f32
    %165 = vector.broadcast %cst_52 : f32 to vector<16x128xf32>
    %cst_53 = arith.constant 0.000000e+00 : f32
    %166 = vector.broadcast %cst_53 : f32 to vector<16x128xf32>
    %167 = vector.extract_strided_slice %161 {offsets = [0, 0], sizes = [16, 128], strides = [1, 1]} : vector<64x128xf32> to vector<16x128xf32>
    %168 = vector.extract_strided_slice %164 {offsets = [0, 0], sizes = [16, 128], strides = [1, 1]} : vector<64x128xf32> to vector<16x128xf32>
    %169 = arith.addf %11, %168 : vector<16x128xf32>
    %170 = arith.negf %169 : vector<16x128xf32>
    %171 = math.exp %170 : vector<16x128xf32>
    %cst_54 = arith.constant 1.000000e+00 : f32
    %172 = vector.broadcast %cst_54 : f32 to vector<16x128xf32>
    %173 = arith.addf %172, %171 : vector<16x128xf32>
    %174 = arith.divf %172, %173 : vector<16x128xf32>
    %175 = arith.addf %165, %167 : vector<16x128xf32>
    %176 = arith.mulf %174, %167 : vector<16x128xf32>
    %177 = arith.addf %166, %176 : vector<16x128xf32>
    %178 = vector.extract_strided_slice %161 {offsets = [16, 0], sizes = [16, 128], strides = [1, 1]} : vector<64x128xf32> to vector<16x128xf32>
    %179 = vector.extract_strided_slice %164 {offsets = [16, 0], sizes = [16, 128], strides = [1, 1]} : vector<64x128xf32> to vector<16x128xf32>
    %180 = arith.addf %11, %179 : vector<16x128xf32>
    %181 = arith.negf %180 : vector<16x128xf32>
    %182 = math.exp %181 : vector<16x128xf32>
    %cst_55 = arith.constant 1.000000e+00 : f32
    %183 = vector.broadcast %cst_55 : f32 to vector<16x128xf32>
    %184 = arith.addf %183, %182 : vector<16x128xf32>
    %185 = arith.divf %183, %184 : vector<16x128xf32>
    %186 = arith.addf %175, %178 : vector<16x128xf32>
    %187 = arith.mulf %185, %178 : vector<16x128xf32>
    %188 = arith.addf %177, %187 : vector<16x128xf32>
    %189 = vector.extract_strided_slice %161 {offsets = [32, 0], sizes = [16, 128], strides = [1, 1]} : vector<64x128xf32> to vector<16x128xf32>
    %190 = vector.extract_strided_slice %164 {offsets = [32, 0], sizes = [16, 128], strides = [1, 1]} : vector<64x128xf32> to vector<16x128xf32>
    %191 = arith.addf %11, %190 : vector<16x128xf32>
    %192 = arith.negf %191 : vector<16x128xf32>
    %193 = math.exp %192 : vector<16x128xf32>
    %cst_56 = arith.constant 1.000000e+00 : f32
    %194 = vector.broadcast %cst_56 : f32 to vector<16x128xf32>
    %195 = arith.addf %194, %193 : vector<16x128xf32>
    %196 = arith.divf %194, %195 : vector<16x128xf32>
    %197 = arith.addf %186, %189 : vector<16x128xf32>
    %198 = arith.mulf %196, %189 : vector<16x128xf32>
    %199 = arith.addf %188, %198 : vector<16x128xf32>
    %200 = vector.extract_strided_slice %161 {offsets = [48, 0], sizes = [16, 128], strides = [1, 1]} : vector<64x128xf32> to vector<16x128xf32>
    %201 = vector.extract_strided_slice %164 {offsets = [48, 0], sizes = [16, 128], strides = [1, 1]} : vector<64x128xf32> to vector<16x128xf32>
    %202 = arith.addf %11, %201 : vector<16x128xf32>
    %203 = arith.negf %202 : vector<16x128xf32>
    %204 = math.exp %203 : vector<16x128xf32>
    %cst_57 = arith.constant 1.000000e+00 : f32
    %205 = vector.broadcast %cst_57 : f32 to vector<16x128xf32>
    %206 = arith.addf %205, %204 : vector<16x128xf32>
    %207 = arith.divf %205, %206 : vector<16x128xf32>
    %208 = arith.addf %197, %200 : vector<16x128xf32>
    %209 = arith.mulf %207, %200 : vector<16x128xf32>
    %210 = arith.addf %199, %209 : vector<16x128xf32>
    %cst_58 = arith.constant dense<0.000000e+00> : vector<16x128xf32>
    %211 = tpu.matmul %208, %19, %cst_58 {dimension_numbers = #tpu.dot_dimension_numbers<[1], [0], [0], [1], [0, 0, 1, 1], [], []>} : vector<16x128xf32>, vector<128x128xf32>, vector<16x128xf32> -> vector<16x128xf32>
    %212 = arith.addf %9, %211 : vector<16x128xf32>
    %213 = arith.negf %212 : vector<16x128xf32>
    %214 = math.exp %213 : vector<16x128xf32>
    %cst_59 = arith.constant 1.000000e+00 : f32
    %215 = vector.broadcast %cst_59 : f32 to vector<16x128xf32>
    %216 = arith.addf %215, %214 : vector<16x128xf32>
    %217 = arith.divf %215, %216 : vector<16x128xf32>
    %cst_60 = arith.constant dense<0.000000e+00> : vector<16x128xf32>
    %218 = tpu.matmul %210, %25, %cst_60 {dimension_numbers = #tpu.dot_dimension_numbers<[1], [0], [0], [1], [0, 0, 1, 1], [], []>} : vector<16x128xf32>, vector<128x128xf32>, vector<16x128xf32> -> vector<16x128xf32>
    %219 = arith.addf %17, %218 : vector<16x128xf32>
    %220 = math.tanh %219 : vector<16x128xf32>
    %cst_61 = arith.constant 1.000000e+00 : f32
    %221 = vector.broadcast %cst_61 : f32 to vector<16x128xf32>
    %222 = arith.subf %221, %217 : vector<16x128xf32>
    %223 = arith.mulf %222, %208 : vector<16x128xf32>
    %224 = arith.mulf %217, %220 : vector<16x128xf32>
    %225 = arith.addf %223, %224 : vector<16x128xf32>
    %226 = vector.broadcast %3 : vector<16x1xf32> to vector<16x128xf32>
    %227 = arith.mulf %225, %226 : vector<16x128xf32>
    %c0_62 = arith.constant 0 : index
    %c0_63 = arith.constant 0 : index
    %228 = vector.load %arg4[%c0_62, %c0_63] : memref<16x16xbf16, #tpu.memory_space<vmem>>, vector<16x16xbf16>
    %229 = arith.extf %228 : vector<16x16xbf16> to vector<16x16xf32>
    %cst_64 = arith.constant dense<0.000000e+00> : vector<16x128xf32>
    %230 = tpu.matmul %229, %227, %cst_64 {dimension_numbers = #tpu.dot_dimension_numbers<[1], [0], [0], [1], [0, 0, 1, 1], [], []>} : vector<16x16xf32>, vector<16x128xf32>, vector<16x128xf32> -> vector<16x128xf32>
    %c0_65 = arith.constant 0 : index
    %c0_66 = arith.constant 0 : index
    %231 = vector.load %arg2[%c0_65, %c0_66] : memref<16x16xbf16, #tpu.memory_space<vmem>>, vector<16x16xbf16>
    %c0_67 = arith.constant 0 : index
    %c0_68 = arith.constant 0 : index
    %232 = vector.load %arg14[%c0_67, %c0_68] : memref<16x128xbf16, #tpu.memory_space<vmem>>, vector<16x128xbf16>
    %cst_69 = arith.constant dense<0.000000e+00> : vector<16x128xf32>
    %233 = tpu.matmul %231, %232, %cst_69 {dimension_numbers = #tpu.dot_dimension_numbers<[1], [0], [0], [1], [0, 0, 1, 1], [], []>} : vector<16x16xbf16>, vector<16x128xbf16>, vector<16x128xf32> -> vector<16x128xf32>
    %c0_70 = arith.constant 0 : index
    %c0_71 = arith.constant 0 : index
    %234 = vector.load %arg15[%c0_70, %c0_71] : memref<128x128xbf16, #tpu.memory_space<vmem>>, vector<128x128xbf16>
    %235 = arith.extf %234 : vector<128x128xbf16> to vector<128x128xf32>
    %cst_72 = arith.constant dense<0.000000e+00> : vector<16x128xf32>
    %236 = tpu.matmul %230, %235, %cst_72 {dimension_numbers = #tpu.dot_dimension_numbers<[1], [0], [0], [1], [0, 0, 1, 1], [], []>} : vector<16x128xf32>, vector<128x128xf32>, vector<16x128xf32> -> vector<16x128xf32>
    %237 = arith.addf %233, %236 : vector<16x128xf32>
    %c0_73 = arith.constant 0 : index
    %c0_74 = arith.constant 0 : index
    %238 = vector.load %arg16[%c0_73, %c0_74] : memref<1x128xbf16, #tpu.memory_space<vmem>>, vector<1x128xbf16>
    %239 = arith.extf %238 : vector<1x128xbf16> to vector<1x128xf32>
    %240 = vector.broadcast %239 : vector<1x128xf32> to vector<16x128xf32>
    %241 = arith.addf %237, %240 : vector<16x128xf32>
    %cst_75 = arith.constant 0.000000e+00 : f32
    %242 = vector.broadcast %cst_75 : f32 to vector<16x128xf32>
    %243 = arith.maximumf %241, %242 : vector<16x128xf32>
    %c0_76 = arith.constant 0 : index
    %c0_77 = arith.constant 0 : index
    %244 = vector.load %arg18[%c0_76, %c0_77] : memref<16x1xf32, #tpu.memory_space<vmem>>, vector<16x1xf32>
    %245 = vector.broadcast %244 : vector<16x1xf32> to vector<16x128xf32>
    %246 = arith.mulf %243, %245 : vector<16x128xf32>
    %c0_78 = arith.constant 0 : index
    %c0_79 = arith.constant 0 : index
    %247 = vector.load %arg19[%c0_78, %c0_79] : memref<16x128xf32, #tpu.memory_space<vmem>>, vector<16x128xf32>
    tpu.vector_store %arg19[%c0_78, %c0_79], %246 {strides = array<i32>} : memref<16x128xf32, #tpu.memory_space<vmem>>, vector<16x128xf32>,
    return
  }
  func.func @transform_0(%arg0: i32) -> (i32, i32) {
    %c0_i32 = arith.constant 0 : i32
    %c0_i32_0 = arith.constant 0 : i32
    %c0_i32_1 = arith.constant 0 : i32
    return %c0_i32, %c0_i32_0 : i32, i32
  }
  func.func @transform_1(%arg0: i32) -> (i32, i32) {
    %c0_i32 = arith.constant 0 : i32
    %c0_i32_0 = arith.constant 0 : i32
    %c0_i32_1 = arith.constant 0 : i32
    return %c0_i32, %c0_i32_0 : i32, i32
  }
  func.func @transform_2(%arg0: i32) -> (i32, i32) {
    %c0_i32 = arith.constant 0 : i32
    %c0_i32_0 = arith.constant 0 : i32
    %c0_i32_1 = arith.constant 0 : i32
    return %c0_i32, %c0_i32_0 : i32, i32
  }
  func.func @transform_3(%arg0: i32) -> (i32, i32) {
    %c0_i32 = arith.constant 0 : i32
    %c0_i32_0 = arith.constant 0 : i32
    %c0_i32_1 = arith.constant 0 : i32
    return %c0_i32, %c0_i32_0 : i32, i32
  }
  func.func @transform_4(%arg0: i32) -> (i32, i32) {
    %c0_i32 = arith.constant 0 : i32
    %c0_i32_0 = arith.constant 0 : i32
    %c0_i32_1 = arith.constant 0 : i32
    return %c0_i32, %c0_i32_0 : i32, i32
  }
  func.func @transform_5(%arg0: i32) -> (i32, i32) {
    %c0_i32 = arith.constant 0 : i32
    %c0_i32_0 = arith.constant 0 : i32
    %c0_i32_1 = arith.constant 0 : i32
    return %c0_i32, %c0_i32_0 : i32, i32
  }
  func.func @transform_6(%arg0: i32) -> (i32, i32) {
    %c0_i32 = arith.constant 0 : i32
    %c0_i32_0 = arith.constant 0 : i32
    %c0_i32_1 = arith.constant 0 : i32
    return %c0_i32, %c0_i32_0 : i32, i32
  }
  func.func @transform_7(%arg0: i32) -> (i32, i32) {
    %c0_i32 = arith.constant 0 : i32
    %c0_i32_0 = arith.constant 0 : i32
    %c0_i32_1 = arith.constant 0 : i32
    return %c0_i32, %c0_i32_0 : i32, i32
  }
  func.func @transform_8(%arg0: i32) -> (i32, i32) {
    %c0_i32 = arith.constant 0 : i32
    %c0_i32_0 = arith.constant 0 : i32
    %c0_i32_1 = arith.constant 0 : i32
    return %c0_i32, %c0_i32_0 : i32, i32
  }
  func.func @transform_9(%arg0: i32) -> (i32, i32) {
    %c0_i32 = arith.constant 0 : i32
    %c0_i32_0 = arith.constant 0 : i32
    %c0_i32_1 = arith.constant 0 : i32
    return %c0_i32, %c0_i32_0 : i32, i32
  }
  func.func @transform_10(%arg0: i32) -> (i32, i32) {
    %c0_i32 = arith.constant 0 : i32
    %c0_i32_0 = arith.constant 0 : i32
    %c0_i32_1 = arith.constant 0 : i32
    return %c0_i32, %c0_i32_0 : i32, i32
  }
  func.func @transform_11(%arg0: i32) -> (i32, i32) {
    %c0_i32 = arith.constant 0 : i32
    %c0_i32_0 = arith.constant 0 : i32
    %c0_i32_1 = arith.constant 0 : i32
    return %c0_i32, %c0_i32_0 : i32, i32
  }
  func.func @transform_12(%arg0: i32) -> (i32, i32) {
    %c0_i32 = arith.constant 0 : i32
    %c0_i32_0 = arith.constant 0 : i32
    %c0_i32_1 = arith.constant 0 : i32
    return %c0_i32, %c0_i32_0 : i32, i32
  }
  func.func @transform_13(%arg0: i32) -> (i32, i32) {
    %c0_i32 = arith.constant 0 : i32
    %c0_i32_0 = arith.constant 0 : i32
    %c0_i32_1 = arith.constant 0 : i32
    return %c0_i32, %c0_i32_0 : i32, i32
  }
  func.func @transform_14(%arg0: i32) -> (i32, i32) {
    %c0_i32 = arith.constant 0 : i32
    %c0_i32_0 = arith.constant 0 : i32
    %c0_i32_1 = arith.constant 0 : i32
    return %c0_i32, %c0_i32_0 : i32, i32
  }
  func.func @transform_15(%arg0: i32) -> (i32, i32) {
    %c0_i32 = arith.constant 0 : i32
    %c0_i32_0 = arith.constant 0 : i32
    %c0_i32_1 = arith.constant 0 : i32
    return %c0_i32, %c0_i32_0 : i32, i32
  }
  func.func @transform_16(%arg0: i32) -> (i32, i32) {
    %c0_i32 = arith.constant 0 : i32
    %c0_i32_0 = arith.constant 0 : i32
    %c0_i32_1 = arith.constant 0 : i32
    return %c0_i32, %c0_i32_0 : i32, i32
  }
  func.func @transform_17(%arg0: i32) -> (i32, i32) {
    %c0_i32 = arith.constant 0 : i32
    %c0_i32_0 = arith.constant 0 : i32
    %c0_i32_1 = arith.constant 0 : i32
    return %c0_i32, %c0_i32_0 : i32, i32
  }
  func.func @transform_18(%arg0: i32) -> (i32, i32) {
    %c0_i32 = arith.constant 0 : i32
    %c0_i32_0 = arith.constant 0 : i32
    %c0_i32_1 = arith.constant 0 : i32
    return %c0_i32, %c0_i32_0 : i32, i32
  }
}

</mosaic_0001>

<bundles_post_ra>
// kernel: tpu_custom_call.1
= control target key start
LH: loop header
LB: loop body
LE: loop exit
PB: predicated region body
PF: predicated region fallthrough
CT: control target
= control target key end

     0   :  { %s4750_s0 = inlined_call_operand.hbm [shape: bf16[16,20], index: 0, kind: input, shape index: {}]   ;;  %s4751_s1 = inlined_call_operand.hbm [shape: bf16[16,16], index: 1, kind: input, shape index: {}]   ;;  %s4752_s2 = inlined_call_operand.vmem [shape: bf16[64,16], index: 2, kind: input, shape index: {}]   ;;  %s4753_s3 = inlined_call_operand.hbm [shape: bf16[16,16], index: 3, kind: input, shape index: {}]   ;;  %s4754_s4 = inlined_call_operand.vmem [shape: bf16[20,128], index: 4, kind: input, shape index: {}]   ;;  %s4755_s5 = inlined_call_operand.vmem [shape: bf16[128,128], index: 5, kind: input, shape index: {}]   ;;  %s4756_s6 = inlined_call_operand.hbm [shape: bf16[1,128], index: 6, kind: input, shape index: {}]   ;;  %s4757_s7 = inlined_call_operand.vmem [shape: bf16[20,128], index: 7, kind: input, shape index: {}]   ;;  %s4758_s8 = inlined_call_operand.hbm [shape: bf16[128,128], index: 8, kind: input, shape index: {}]   ;;  %s4759_s9 = inlined_call_operand.hbm [shape: bf16[1,128], index: 9, kind: input, shape index: {}]   ;;  %s4760_s10 = inlined_call_operand.vmem [shape: bf16[20,128], index: 10, kind: input, shape index: {}]   ;;  %s4761_s11 = inlined_call_operand.hbm [shape: bf16[128,128], index: 11, kind: input, shape index: {}]   ;;  %s4762_s12 = inlined_call_operand.vmem [shape: bf16[1,128], index: 12, kind: input, shape index: {}]   ;;  %s4763_s13 = inlined_call_operand.vmem [shape: bf16[16,128], index: 13, kind: input, shape index: {}]   ;;  %s4764_s14 = inlined_call_operand.hbm [shape: bf16[128,128], index: 14, kind: input, shape index: {}]   ;;  %s4765_s15 = inlined_call_operand.vmem [shape: bf16[1,128], index: 15, kind: input, shape index: {}]   ;;  %s4766_s16 = inlined_call_operand.vmem [shape: f32[16,1], index: 16, kind: input, shape index: {}]   ;;  %s4767_s17 = inlined_call_operand.vmem [shape: f32[16,1], index: 17, kind: input, shape index: {}]   ;;  %s4768_s18 = inlined_call_operand.hbm [shape: f32[16,128], index: 18, kind: output, shape index: {}]  }
   0x1   :  { %4792 = sst [smem:[#allocation29_spill]] %s4750_s0 }
   0x2   :  { %4793 = sst [smem:[#allocation30_spill]] %s4751_s1 }
   0x3   :  { %4794 = sst [smem:[#allocation31_spill]] %s4752_s2 }
   0x4   :  { %23 = vsyncpa [#allocation3], 0 }
   0x5   :  { %24 = vsyncpa [#allocation6], 0 }
   0x6   :  { %25 = vsyncpa [#allocation9], 0 }
   0x7   :  { %26 = vsyncpa [#allocation12], 0 }
   0x8   :  { %27 = vsyncpa [#allocation15], 0 }
   0x9   :  { %28 = vsyncpa [#allocation4], 0  ;;  %s3866_s27 = smov [#allocation5]   ;;  %s3867_s29 = smov [#allocation8]  }
   0xa   :  { %s46_s28 = sshll.u32 %s3866_s27, 4  ;;  %s77_s30 = sshll.u32 %s3867_s29, 4  ;;  %s47_s28 = int_to_ptr.vmem [resolvable:$true] %s46_s28  ;;  %s3977_s30 = int_to_ptr.vmem [resolvable:$true] %s77_s30 }
   0xb   :  { %s4795_s1 = sld [smem:[#allocation30_spill]] }
  0x11   :  { %s3656_s20 = scalar_lea.hbm %s4795_s1, 128 }
  0x12   :  { %p3657_p0 = scmp.ne.s32.totalorder %s4795_s1, %s3656_s20  ;;  %p3660_p1 = scmp.lt.u32.totalorder %s3656_s20, %s4795_s1 }
  0x14   :  { %p3662_p2 = pnand %p3660_p1, %p3657_p0 }
  0x16   :  { %3665 = shalt.err (!%p3662_p2)
}
  0x17   :  { %s3666_s24 = scalar_lea.vmem %s47_s28, 128  ;;  %p3671_p4 = scmp.lt.s32.totalorder %s47_s28, %s47_s28 }
  0x18   :  { %p3667_p3 = scmp.ne.s32.totalorder %s47_s28, %s3666_s24  ;;  %p3672_p5 = scmp.lt.s32.totalorder %s3666_s24, %s3666_s24 }
  0x1a   :  { %p3673_p6 = por %p3672_p5, %p3671_p4 }
  0x1c   :  { %p3674_p7 = pnand %p3673_p6, %p3667_p3 }
  0x1e   :  { %3677 = shalt.err (!%p3674_p7)
}
  0x1f   :  { %s4772_s25 = smov 64   ;;  %s3869_s26 = smov 4  }
  0x20   :  { %52 = dma.hbm_to_vmem [thread:$0]  %s4795_s1, 128, %s47_s28, [#allocation6], %s4772_s25, %s4772_s25, %s3869_s26  }
  0x21   :  { %s3678_s20 = scalar_lea.hbm %s4756_s6, 16 }
  0x22   :  { %p3679_p8 = scmp.ne.s32.totalorder %s4756_s6, %s3678_s20  ;;  %p3682_p9 = scmp.lt.u32.totalorder %s3678_s20, %s4756_s6 }
  0x24   :  { %p3684_p10 = pnand %p3682_p9, %p3679_p8 }
  0x26   :  { %3687 = shalt.err (!%p3684_p10)
}
  0x27   :  { %s3688_s24 = scalar_lea.vmem %s3977_s30, 16  ;;  %s3692_s28 = scalar_lea.vmem %s3977_s30, 32 }
  0x28   :  { %p3689_p11 = scmp.ne.s32.totalorder %s3977_s30, %s3688_s24  ;;  %p3693_p12 = scmp.lt.s32.totalorder %s3977_s30, %s3977_s30 }
  0x29   :  { %p3694_p13 = scmp.lt.s32.totalorder %s3692_s28, %s3688_s24 }
  0x2b   :  { %p3695_p0 = por %p3694_p13, %p3693_p12 }
  0x2d   :  { %p3696_p1 = pnand %p3695_p0, %p3689_p11 }
  0x2f   :  { %3699 = shalt.err (!%p3696_p1)
}
  0x30   :  { %80 = dma.hbm_to_vmem [thread:$0]  %s4756_s6, 16, %s3977_s30, [#allocation9]  }
  0x31   :  { %s3870_s29 = smov [#allocation11]   ;;  %s3871_s19 = smov [#allocation2]  }
  0x32   :  { %s101_s0 = sshll.u32 %s3870_s29, 4  ;;  %s34_s20 = sshll.u32 %s3871_s19, 4  ;;  %s102_s0 = int_to_ptr.vmem [resolvable:$true] %s101_s0  ;;  %s4012_s20 = int_to_ptr.vmem [resolvable:$true] %s34_s20 }
  0x33   :  { %s3700_s2 = scalar_lea.hbm %s4759_s9, 16 }
  0x34   :  { %p3701_p2 = scmp.ne.s32.totalorder %s4759_s9, %s3700_s2  ;;  %p3704_p3 = scmp.lt.u32.totalorder %s3700_s2, %s4759_s9 }
  0x36   :  { %p3706_p4 = pnand %p3704_p3, %p3701_p2 }
  0x38   :  { %3709 = shalt.err (!%p3706_p4)
}
  0x39   :  { %s3710_s6 = scalar_lea.vmem %s102_s0, 16  ;;  %s3714_s30 = scalar_lea.vmem %s102_s0, 32 }
  0x3a   :  { %p3711_p5 = scmp.ne.s32.totalorder %s102_s0, %s3710_s6  ;;  %p3715_p6 = scmp.lt.s32.totalorder %s102_s0, %s102_s0 }
  0x3b   :  { %p3716_p7 = scmp.lt.s32.totalorder %s3714_s30, %s3710_s6 }
  0x3d   :  { %p3717_p8 = por %p3716_p7, %p3715_p6 }
  0x3f   :  { %p3718_p9 = pnand %p3717_p8, %p3711_p5 }
  0x41   :  { %3721 = shalt.err (!%p3718_p9)
}
  0x42   :  { %104 = dma.hbm_to_vmem [thread:$0]  %s4759_s9, 16, %s102_s0, [#allocation12]  }
  0x43   :  { %s4796_s21 = sld [smem:[#allocation29_spill]] }
  0x49   :  { %s3722_s22 = scalar_lea.hbm %s4796_s21, 128 }
  0x4a   :  { %p3723_p10 = scmp.ne.s32.totalorder %s4796_s21, %s3722_s22  ;;  %p3726_p11 = scmp.lt.u32.totalorder %s3722_s22, %s4796_s21 }
  0x4c   :  { %p3728_p12 = pnand %p3726_p11, %p3723_p10 }
  0x4e   :  { %3731 = shalt.err (!%p3728_p12)
}
  0x4f   :  { %s3732_s28 = scalar_lea.vmem %s4012_s20, 128  ;;  %p3737_p0 = scmp.lt.s32.totalorder %s4012_s20, %s4012_s20 }
  0x50   :  { %p3733_p13 = scmp.ne.s32.totalorder %s4012_s20, %s3732_s28  ;;  %p3738_p1 = scmp.lt.s32.totalorder %s3732_s28, %s3732_s28 }
  0x52   :  { %p3739_p2 = por %p3738_p1, %p3737_p0 }
  0x54   :  { %p3740_p3 = pnand %p3739_p2, %p3733_p13 }
  0x56   :  { %3743 = shalt.err (!%p3740_p3)
}
  0x57   :  { %s4797_s9 = smov 64   ;;  %s3872_s30 = smov [#allocation7]  }
  0x58   :  { %40 = dma.hbm_to_vmem [thread:$0]  %s4796_s21, 128, %s4012_s20, [#allocation3], %s4797_s9, %s4797_s9, %s3869_s26  }
  0x59   :  { %s60_s1 = sshll.u32 %s3872_s30, 4  ;;  %s3873_s27 = smov [#allocation10]   ;;  %s61_s1 = int_to_ptr.vmem [resolvable:$true] %s60_s1 }
  0x5a   :  { %s88_s29 = sshll.u32 %s3873_s27, 4  ;;  %s3744_s25 = scalar_lea.hbm %s4753_s3, 128  ;;  %s4046_s29 = int_to_ptr.vmem [resolvable:$true] %s88_s29 }
  0x5b   :  { %p3745_p4 = scmp.ne.s32.totalorder %s4753_s3, %s3744_s25  ;;  %p3748_p5 = scmp.lt.u32.totalorder %s3744_s25, %s4753_s3 }
  0x5d   :  { %p3750_p6 = pnand %p3748_p5, %p3745_p4 }
  0x5f   :  { %3753 = shalt.err (!%p3750_p6)
}
  0x60   :  { %s3754_s20 = scalar_lea.vmem %s61_s1, 128  ;;  %p3759_p8 = scmp.lt.s32.totalorder %s61_s1, %s61_s1 }
  0x61   :  { %p3755_p7 = scmp.ne.s32.totalorder %s61_s1, %s3754_s20  ;;  %p3760_p9 = scmp.lt.s32.totalorder %s3754_s20, %s3754_s20 }
  0x63   :  { %p3761_p10 = por %p3760_p9, %p3759_p8 }
  0x65   :  { %p3762_p11 = pnand %p3761_p10, %p3755_p7 }
  0x67   :  { %3765 = shalt.err (!%p3762_p11)
}
  0x68   :  { %66 = dma.hbm_to_vmem [thread:$0]  %s4753_s3, 128, %s61_s1, [#allocation6], %s4797_s9, %s4797_s9, %s3869_s26  }
  0x69   :  { %s3766_s27 = scalar_lea.hbm %s4758_s8, 1024 }
  0x6a   :  { %p3767_p12 = scmp.ne.s32.totalorder %s4758_s8, %s3766_s27  ;;  %p3770_p13 = scmp.lt.u32.totalorder %s3766_s27, %s4758_s8 }
  0x6c   :  { %p3772_p0 = pnand %p3770_p13, %p3767_p12 }
  0x6e   :  { %3775 = shalt.err (!%p3772_p0)
}
  0x6f   :  { %s3776_s23 = scalar_lea.vmem %s4046_s29, 1024  ;;  %p3781_p2 = scmp.lt.s32.totalorder %s4046_s29, %s4046_s29 }
  0x70   :  { %p3777_p1 = scmp.ne.s32.totalorder %s4046_s29, %s3776_s23  ;;  %p3782_p3 = scmp.lt.s32.totalorder %s3776_s23, %s3776_s23 }
  0x72   :  { %p3783_p4 = por %p3782_p3, %p3781_p2 }
  0x74   :  { %p3784_p5 = pnand %p3783_p4, %p3777_p1 }
  0x76   :  { %3787 = shalt.err (!%p3784_p5)
}
  0x77   :  { %94 = dma.hbm_to_vmem [thread:$0]  %s4758_s8, 1024, %s4046_s29, [#allocation9], %s4797_s9, %s4797_s9, %s3869_s26  }
  0x78   :  { %s3874_s24 = smov [#allocation13]   ;;  %s3875_s20 = smov [#allocation14]  }
  0x79   :  { %s112_s28 = sshll.u32 %s3874_s24, 4  ;;  %s128_s21 = sshll.u32 %s3875_s20, 4  ;;  %s113_s28 = int_to_ptr.vmem [resolvable:$true] %s112_s28  ;;  %s4083_s21 = int_to_ptr.vmem [resolvable:$true] %s128_s21 }
  0x7a   :  { %s3788_s30 = scalar_lea.hbm %s4761_s11, 1024 }
  0x7b   :  { %p3789_p6 = scmp.ne.s32.totalorder %s4761_s11, %s3788_s30  ;;  %p3792_p7 = scmp.lt.u32.totalorder %s3788_s30, %s4761_s11 }
  0x7d   :  { %p3794_p8 = pnand %p3792_p7, %p3789_p6 }
  0x7f   :  { %3797 = shalt.err (!%p3794_p8)
}
  0x80   :  { %s3798_s8 = scalar_lea.vmem %s113_s28, 1024  ;;  %p3803_p10 = scmp.lt.s32.totalorder %s113_s28, %s113_s28 }
  0x81   :  { %p3799_p9 = scmp.ne.s32.totalorder %s113_s28, %s3798_s8  ;;  %p3804_p11 = scmp.lt.s32.totalorder %s3798_s8, %s3798_s8 }
  0x83   :  { %p3805_p12 = por %p3804_p11, %p3803_p10 }
  0x85   :  { %p3806_p13 = pnand %p3805_p12, %p3799_p9 }
  0x87   :  { %3809 = shalt.err (!%p3806_p13)
}
  0x88   :  { %118 = dma.hbm_to_vmem [thread:$0]  %s4761_s11, 1024, %s113_s28, [#allocation12], %s4797_s9, %s4797_s9, %s3869_s26  }
  0x89   :  { %s3810_s1 = scalar_lea.hbm %s4764_s14, 1024 }
  0x8a   :  { %p3811_p0 = scmp.ne.s32.totalorder %s4764_s14, %s3810_s1  ;;  %p3814_p1 = scmp.lt.u32.totalorder %s3810_s1, %s4764_s14 }
  0x8c   :  { %p3816_p2 = pnand %p3814_p1, %p3811_p0 }
  0x8e   :  { %3819 = shalt.err (!%p3816_p2)
}
  0x8f   :  { %s3820_s30 = scalar_lea.vmem %s4083_s21, 1024  ;;  %p3825_p4 = scmp.lt.s32.totalorder %s4083_s21, %s4083_s21 }
  0x90   :  { %p3821_p3 = scmp.ne.s32.totalorder %s4083_s21, %s3820_s30  ;;  %p3826_p5 = scmp.lt.s32.totalorder %s3820_s30, %s3820_s30 }
  0x92   :  { %p3827_p6 = por %p3826_p5, %p3825_p4 }
  0x94   :  { %p3828_p7 = pnand %p3827_p6, %p3821_p3 }
  0x96   :  { %3831 = shalt.err (!%p3828_p7)
}
  0x97   :  { %134 = dma.hbm_to_vmem [thread:$0]  %s4764_s14, 1024, %s4083_s21, [#allocation15], %s4797_s9, %s4797_s9, %s3869_s26  }
  0x98   :  { %3854 = dma.done.wait [#allocation3], 128  }
  0x99   :  { %3855 = vsyncadd [#allocation3], 4294967168 }
  0x9a   :  { %3856 = dma.done.wait [#allocation6], 256  }
  0x9b   :  { %3857 = vsyncadd [#allocation6], 4294967040 }
  0x9c   :  { %3858 = dma.done.wait [#allocation9], 1040  }
  0x9d   :  { %3859 = vsyncadd [#allocation9], 4294966256 }
  0x9e   :  { %3860 = dma.done.wait [#allocation12], 1040  }
  0x9f   :  { %3861 = vsyncadd [#allocation12], 4294966256 }
  0xa0   :  { %3862 = dma.done.wait [#allocation15], 1024  }
  0xa1   :  { %3863 = vsyncadd [#allocation15], 4294966272  ;;  %v4774_v0 = vmov 0.0   ;;  %vm3877_vm0 = vmmov 0   ;;  %v3515_v1 = vld [vmem:[%s4757_s7] sm:$0xff]   ;;  %vm213_vm1 = vcmask 1041408  }
  0xa2   :  { %2713 = vmatprep.subr.bf16.mxu1 %v4774_v0  ;;  %2717 = vmatprep.mubr.msk.bf16.mxu1 %vm3877_vm0, %v4774_v0  ;;  %v3516_v2 = vld [vmem:[%s4757_s7 + $0x8] ss:$0 sps:$4 sm:$0x33]   ;;  %s4798_s22 = sld [smem:[#allocation31_spill]]  ;;  %vm209_vm2 = vcmask 162816   ;;  %v3518_v5 = vld [vmem:[%s4754_s4] sm:$0xff]  }
  0xa3   :  { %2705 = vmatprep.subr.bf16.mxu0 %v4774_v0  ;;  %2709 = vmatprep.mubr.msk.bf16.mxu0 %vm3877_vm0, %v4774_v0  ;;  %v271_v3 = vsel %vm213_vm1, %v3516_v2, 0  ;;  %v3517_v6 = vld [vmem:[#allocation2] sm:$0xff]   ;;  %v3519_v7 = vld [vmem:[%s4754_s4 + $0x8] ss:$0 sps:$4 sm:$0x33]   ;;  %vm474_vm3 = vcmask 130048  }
  0xa4   :  { %2714 = vmatpush3.bf16.msra.mxu1 %v3515_v1  ;;  %2706 = vmatpush3.bf16.msra.mxu0 %v3518_v5  ;;  %v215_v9 = vsel %vm213_vm1, %v3519_v7, 0  ;;  %v4151_v10 = vld [vmem:[%s4755_s5] sm:$0xff]   ;;  %v3521_v13 = vld [vmem:[%s4760_s10 + $0x8] ss:$0 sps:$4 sm:$0x33]   ;;  %v4219_v27 = vld [vmem:[#allocation10 + $0x10] sm:$0xff]  }
  0xa5   :  { %2715 = vmatprep.subr.bf16.mxu1 %v4774_v0  ;;  %2707 = vmatprep.subr.bf16.mxu0 %v4774_v0  ;;  %v3520_v12 = vld [vmem:[%s4760_s10] sm:$0xff]   ;;  %v333_v17 = vsel %vm213_vm1, %v3521_v13, 0  ;;  %v4183_v18 = vld [vmem:[%s4755_s5 + $0x8] sm:$0xff]   ;;  %v4227_v28 = vld [vmem:[#allocation10 + $0x18] sm:$0xff]   ;;  %v3878_v13 = vmov 0  }
  0xa6   :  { %v4189_v20 = vld [vmem:[#allocation10] sm:$0xff]   ;;  %v4205_v24 = vld [vmem:[#allocation10 + $0x8] sm:$0xff]   ;;  %v4243_v31 = vld [vmem:[%s4755_s5 + $0x10] sm:$0xff]   ;;  %3513 = vset.pattern.permute.xlu0 %v3878_v13  ;;  %3514 = vset.pattern.permute.xlu1 %v3878_v13 }
  0xa7   :  { %v4231_v29 = vld [vmem:[#allocation10 + $0x20] sm:$0xff]   ;;  %v4235_v30 = vld [vmem:[#allocation10 + $0x28] sm:$0xff]   ;;  %v4247_v32 = vld [vmem:[#allocation10 + $0x30] sm:$0xff]  }
  0xa8   :  { %v2285_v4 = vld [vmem:[%s4798_s22] sm:$0xff]   ;;  %2716 = vmatpush3.bf16.msra.mxu1 %v271_v3  ;;  %v2432_v11 = vld [vmem:[%s4798_s22 + $0x8] sm:$0xff]   ;;  %2708 = vmatpush3.bf16.msra.mxu0 %v215_v9  ;;  %v2433_v16 = vld [vmem:[%s4798_s22 + $0x10] sm:$0xff]  }
  0xa9   :  { %v4143_v8 = vunpack.c.l.bf16 %v2285_v4  ;;  %2729 = vmatprep.subr.mxu1 %v4774_v0  ;;  %2721 = vmatprep.subr.bf16.mxu0 %v4774_v0  ;;  %v4168_v14 = vunpack.c.h.bf16 %v2285_v4  ;;  %v4170_v15 = vunpack.c.l.bf16 %v2432_v11  ;;  %v4187_v19 = vunpack.c.h.bf16 %v2432_v11  ;;  %v2434_v22 = vld [vmem:[%s4798_s22 + $0x18] sm:$0xff]   ;;  %v4265_v35 = vld [vmem:[%s4755_s5 + $0x20] sm:$0xff]   ;;  %v4272_v36 = vld [vmem:[%s4755_s5 + $0x28] sm:$0xff]  }
  0xaa   :  { %v4193_v21 = vunpack.c.l.bf16 %v2433_v16  ;;  %v4203_v23 = vunpack.c.h.bf16 %v2433_v16  ;;  %v4209_v25 = vunpack.c.l.bf16 %v2434_v22  ;;  %v4217_v26 = vunpack.c.h.bf16 %v2434_v22  ;;  %v4253_v33 = vld [vmem:[%s4755_s5 + $0x18] sm:$0xff]   ;;  %v4279_v37 = vld [vmem:[%s4755_s5 + $0x30] sm:$0xff]   ;;  %v4346_v3 = vld [vmem:[#allocation13 + $0x8] sm:$0xff]  }
  0xab   :  { %2718 = vmatmul.mubr.msk.bf16.vlgmr.msra.gmra.mrb[0].mxu1 %vm209_vm2, %v3517_v6  ;;  %2710 = vmatmul.mubr.msk.bf16.vlgmr.msra.gmra.mrb[0].mxu0 %vm209_vm2, %v3517_v6  ;;  %v4255_v34 = vld [vmem:[#allocation10 + $0x38] sm:$0xff]   ;;  %v4342_v2 = vld [vmem:[#allocation13] sm:$0xff]   ;;  %v4361_v7 = vld [vmem:[#allocation13 + $0x28] sm:$0xff]  }
  0xac   :  { %2730 = vmatpush3.msra.mxu1 %v4774_v0  ;;  %2731 = vmatprep.mubr.msk.f32.mxu1 %vm474_vm3, %v4143_v8  ;;  %v4286_v38 = vld [vmem:[%s4755_s5 + $0x38] sm:$0xff]   ;;  %v4350_v4 = vld [vmem:[#allocation13 + $0x10] sm:$0xff]  }
  0xad   :  { %3198 = vmatprep.subr.bf16.mxu1 %v4151_v10  ;;  %2722 = vmatpush3.bf16.msra.mxu0 %v3520_v12  ;;  %v4354_v5 = vld [vmem:[#allocation13 + $0x18] sm:$0xff]   ;;  %v4365_v9 = vld [vmem:[#allocation13 + $0x30] sm:$0xff]   ;;  %v184_v12 = vld [vmem:[%s4766_s16] sm:$0xff] }
  0xae   :  { %2725 = vmatprep.mubr.msk.bf16.mxu0 %vm3877_vm0, %v4774_v0  ;;  %2723 = vmatprep.subr.bf16.mxu0 %v4774_v0  ;;  %4801 = vst [vmem:[#allocation25_spill] sm:$0xff] %v4365_v9  ;;  %v4369_v11 = vld [vmem:[#allocation13 + $0x38] sm:$0xff]   ;;  %v185_v16 = vld [vmem:[%s4766_s16 + $0x8] sm:$0xff] }
  0xaf   :  { %4802 = vst [vmem:[#allocation26_spill] sm:$0xff] %v4369_v11  ;;  %971 = vperm.xlu0 %3513, %v184_v12   ;;  %v440_v22 = vld [vmem:[#allocation11] sm:$0x1] }
  0xb1   :  { %2724 = vmatpush3.bf16.msra.mxu0 %v333_v17  ;;  %v191_v17 = vlaneseq }
  0xb2   :  { %3166 = vmatprep.subr.bf16.mxu0 %v4189_v20 }
  0xb3   :  { %2732 = vmatmul.mubr.msk.f32.vlgmr.msra.gmra.mrb[4].mxu1 %vm474_vm3, %v4168_v14  ;;  %976 = vperm.xlu0 %3513, %v185_v16  }
  0xb4   :  { %2734 = vmatprep.mubr.msk.f32.mxu1 %vm474_vm3, %v4170_v15  ;;  %3200 = vmatpush3.bf16.msra.mxu1 %v4151_v10 }
  0xb5   :  { %3202 = vmatprep.subr.bf16.mxu1 %v4183_v18  ;;  %2726 = vmatmul.mubr.msk.bf16.vlgmr.msra.gmra.mrb[4].mxu0 %vm209_vm2, %v3517_v6  ;;  %v4358_v6 = vld [vmem:[#allocation13 + $0x20] sm:$0xff]  }
  0xb6   :  { %3168 = vmatpush3.bf16.msra.mxu0 %v4189_v20 }
  0xb7   :  { %2735 = vmatmul.mubr.msk.f32.gmra.mrb[6].mxu1 %vm474_vm3, %v4187_v19  ;;  %3170 = vmatprep.subr.bf16.mxu0 %v4205_v24 }
  0xb8   :  { %2737 = vmatprep.mubr.msk.f32.mxu1 %vm474_vm3, %v4193_v21  ;;  %3204 = vmatpush3.bf16.msra.mxu1 %v4183_v18 }
  0xb9   :  { %3206 = vmatprep.subr.bf16.mxu1 %v4243_v31 }
  0xba   :  { %3172 = vmatpush3.bf16.msra.mxu0 %v4205_v24 }
  0xbb   :  { %2738 = vmatmul.mubr.msk.f32.gmra.mrb[8].mxu1 %vm474_vm3, %v4203_v23  ;;  %3174 = vmatprep.subr.bf16.mxu0 %v4219_v27 }
  0xbc   :  { %2740 = vmatprep.mubr.msk.f32.mxu1 %vm474_vm3, %v4209_v25  ;;  %3208 = vmatpush3.bf16.msra.mxu1 %v4243_v31 }
  0xbd   :  { %3210 = vmatprep.subr.bf16.mxu1 %v4253_v33 }
  0xbe   :  { %3176 = vmatpush3.bf16.msra.mxu0 %v4219_v27 }
  0xbf   :  { %2741 = vmatmul.mubr.msk.f32.gmra.mrb[10].mxu1 %vm474_vm3, %v4217_v26  ;;  %3178 = vmatprep.subr.bf16.mxu0 %v4227_v28 }
  0xc0   :  { %3212 = vmatpush3.bf16.msra.mxu1 %v4253_v33 }
  0xc1   :  { %3214 = vmatprep.subr.bf16.mxu1 %v4265_v35 }
  0xc2   :  { %3180 = vmatpush3.bf16.msra.mxu0 %v4227_v28 }
  0xc3   :  { %3182 = vmatprep.subr.bf16.mxu0 %v4231_v29 }
  0xc4   :  { %3216 = vmatpush3.bf16.msra.mxu1 %v4265_v35 }
  0xc5   :  { %3218 = vmatprep.subr.bf16.mxu1 %v4272_v36 }
  0xc6   :  { %3184 = vmatpush3.bf16.msra.mxu0 %v4231_v29 }
  0xc7   :  { %3186 = vmatprep.subr.bf16.mxu0 %v4235_v30 }
  0xc8   :  { %3220 = vmatpush3.bf16.msra.mxu1 %v4272_v36 }
  0xc9   :  { %3222 = vmatprep.subr.bf16.mxu1 %v4279_v37 }
  0xca   :  { %3188 = vmatpush3.bf16.msra.mxu0 %v4235_v30 }
  0xcb   :  { %3190 = vmatprep.subr.bf16.mxu0 %v4247_v32 }
  0xcc   :  { %3224 = vmatpush3.bf16.msra.mxu1 %v4279_v37 }
  0xcd   :  { %3226 = vmatprep.subr.bf16.mxu1 %v4286_v38 }
  0xce   :  { %3192 = vmatpush3.bf16.msra.mxu0 %v4247_v32 }
  0xcf   :  { %3194 = vmatprep.subr.bf16.mxu0 %v4255_v34 }
  0xd0   :  { %3228 = vmatpush3.bf16.msra.mxu1 %v4286_v38 }
  0xd2   :  { %3196 = vmatpush3.bf16.msra.mxu0 %v4255_v34 }
  0xd3   :  { %3230 = vmatprep.subr.bf16.mxu0 %v4342_v2 }
 0x17e   :  { %v4290_v39 = vpop.f32.mrb[0].mxu1  ;;  %v4294_v43 = vpop.f32.mrb[0].mxu0 }
 0x17f   :  { %4799 = vst [vmem:[#allocation23_spill] sm:$0xff] %v4290_v39  ;;  %v2719_v40 = vpop.f32.mrb[1].mxu1  ;;  %v2711_v44 = vpop.f32.mrb[1].mxu0 }
 0x180   :  { %v4292_v41 = vpop.f32.mrb[2].mxu1  ;;  %v4296_v45 = vpop.f32.mrb[2].mxu0  ;;  %v192_v40 = vshrl.u32 %v191_v17, 7 }
 0x181   :  { %4800 = vst [vmem:[#allocation24_spill] sm:$0xff] %v4292_v41  ;;  %v2720_v42 = vpop.f32.mrb[3].mxu1  ;;  %v2712_v47 = vpop.f32.mrb[3].mxu0 }
 0x182   :  { %v441_v42 = vunpack.c.l.bf16 %v440_v22  ;;  %v4381_v44 = vsub.s32 0, %v192_v40 }
 0x184   :  { %4803 = vst [vmem:[#allocation27_spill] sm:$0xff] %v4381_v44  ;;  %v4384_v47 = vrot.slane %v441_v42, %v4381_v44 }
 0x186   :  { %v4298_v46 = vpop.f32.mrb[4].mxu1  ;;  %4804 = vst [vmem:[#allocation28_spill] sm:$0xff] %v4384_v47 }
 0x187   :  { %v4300_v48 = vpop.f32.mrb[5].mxu1 }
 0x188   :  { %2775 = vmatprep.mubr.f32.mxu0 %v4300_v48  ;;  %v4310_v52 = vpop.f32.mrb[4].mxu0 }
 0x189   :  { %2776 = vmatmul.mubr.f32.vlgmr.msra.gmra.mrb[8].mxu0 %v4298_v46  ;;  %v2727_v54 = vpop.f32.mrb[5].mxu0 }
 0x18a   :  { %v4304_v49 = vpop.f32.mrb[6].mxu1  ;;  %v4316_v55 = vpop.f32.mrb[6].mxu0  ;;  %3232 = vmatpush3.bf16.msra.mxu0 %v4342_v2 }
 0x18b   :  { %v748_v50 = vadd.f32 %v4304_v49, %v4298_v46  ;;  %v4308_v51 = vpop.f32.mrb[7].mxu1  ;;  %v2728_v57 = vpop.f32.mrb[7].mxu0  ;;  %3234 = vmatprep.subr.bf16.mxu0 %v4346_v3 }
 0x18c   :  { %v747_v53 = vadd.f32 %v4308_v51, %v4300_v48  ;;  %2778 = vmatprep.mubr.f32.mxu0 %v4308_v51 }
 0x18d   :  { %2779 = vmatmul.mubr.f32.gmra.mrb[10].mxu0 %v4304_v49 }
 0x18e   :  { %v4318_v56 = vpop.f32.mrb[8].mxu1  ;;  %3236 = vmatpush3.bf16.msra.mxu0 %v4346_v3 }
 0x18f   :  { %v768_v58 = vadd.f32 %v4318_v56, %v748_v50  ;;  %v4321_v59 = vpop.f32.mrb[9].mxu1  ;;  %3238 = vmatprep.subr.bf16.mxu0 %v4350_v4 }
 0x190   :  { %v767_v60 = vadd.f32 %v747_v53, %v4321_v59  ;;  %2781 = vmatprep.mubr.f32.mxu0 %v4321_v59 }
 0x191   :  { %2782 = vmatmul.mubr.f32.gmra.mrb[12].mxu0 %v4318_v56 }
 0x192   :  { %v4326_v61 = vpop.f32.mrb[10].mxu1  ;;  %3240 = vmatpush3.bf16.msra.mxu0 %v4350_v4 }
 0x193   :  { %v4329_v62 = vadd.f32 %v4326_v61, %v768_v58  ;;  %v4331_v63 = vpop.f32.mrb[11].mxu1  ;;  %3242 = vmatprep.subr.bf16.mxu0 %v4354_v5 }
 0x194   :  { %v4334_v1 = vadd.f32 %v767_v60, %v4331_v63  ;;  %2784 = vmatprep.mubr.f32.mxu0 %v4331_v63 }
 0x195   :  { %2785 = vmatmul.mubr.f32.gmra.mrb[14].mxu0 %v4326_v61 }
 0x196   :  { %2819 = vmatprep.mubr.f32.mxu1 %v4334_v1  ;;  %3244 = vmatpush3.bf16.msra.mxu0 %v4354_v5 }
 0x197   :  { %2820 = vmatmul.mubr.f32.vlgmr.msra.gmra.mrb[12].mxu1 %v4329_v62  ;;  %3246 = vmatprep.subr.bf16.mxu0 %v4358_v6 }
 0x198   :  { %2861 = vmatprep.mubr.msk.f32.mxu1 %vm474_vm3, %v4143_v8 }
 0x19a   :  { %3248 = vmatpush3.bf16.msra.mxu0 %v4358_v6 }
 0x19b   :  { %3250 = vmatprep.subr.bf16.mxu0 %v4361_v7 }
 0x19e   :  { %3252 = vmatpush3.bf16.msra.mxu0 %v4361_v7 }
 0x19f   :  { %3254 = vmatprep.subr.bf16.mxu0 %v4365_v9 }
 0x1a2   :  { %3256 = vmatpush3.bf16.msra.mxu0 %v4365_v9 }
 0x1a3   :  { %3258 = vmatprep.subr.bf16.mxu0 %v4369_v11 }
 0x1a6   :  { %3260 = vmatpush3.bf16.msra.mxu0 %v4369_v11 }
 0x1a7   :  { %3298 = vmatprep.subr.bf16.mxu0 %v4151_v10 }
 0x25c   :  { %v2777_v50 = vpop.f32.mrb[8].mxu0 }
 0x25d   :  { %v680_v53 = vadd.f32 %v2777_v50, %v4384_v47  ;;  %v674_v54 = vpop.f32.mrb[9].mxu0 }
 0x25e   :  { %v675_v57 = vadd.f32 %v674_v54, %v4384_v47 }
 0x25f   :  { %v714_v58 = vadd.f32 %v680_v53, %v4292_v41 }
 0x260   :  { %v713_v60 = vadd.f32 %v675_v57, %v4290_v39  ;;  %v2780_v12 = vpop.f32.mrb[10].mxu0 }
 0x261   :  { %v2234_v13 = vmul.f32 -1.442695, %v714_v58  ;;  %v690_v16 = vadd.f32 %v2780_v12, %v4384_v47  ;;  %v684_v17 = vpop.f32.mrb[11].mxu0 }
 0x262   :  { %v2233_v22 = vmul.f32 -1.442695, %v713_v60  ;;  %v685_v40 = vadd.f32 %v684_v17, %v4384_v47 }
 0x263   :  { %3524 = vpow2.f32 %v2234_v13  ;;  %v734_v42 = vadd.f32 %v690_v16, %v4292_v41 }
 0x264   :  { %3526 = vpow2.f32 %v2233_v22  ;;  %v733_v50 = vadd.f32 %v685_v40, %v4290_v39  ;;  %v2783_v0 = vpop.f32.mrb[12].mxu0 }
 0x265   :  { %v2236_v54 = vmul.f32 -1.442695, %v734_v42  ;;  %v700_v53 = vadd.f32 %v2783_v0, %v4384_v47  ;;  %v694_v11 = vpop.f32.mrb[13].mxu0 }
 0x266   :  { %v2235_v57 = vmul.f32 -1.442695, %v733_v50  ;;  %v695_v58 = vadd.f32 %v694_v11, %v4384_v47 }
 0x267   :  { %3528 = vpow2.f32 %v2236_v54  ;;  %v754_v12 = vadd.f32 %v700_v53, %v4292_v41 }
 0x268   :  { %3530 = vpow2.f32 %v2235_v57  ;;  %v753_v60 = vadd.f32 %v695_v58, %v4290_v39  ;;  %v2786_v13 = vpop.f32.mrb[14].mxu0 }
 0x269   :  { %v2238_v17 = vmul.f32 -1.442695, %v754_v12  ;;  %v710_v16 = vadd.f32 %v2786_v13, %v4384_v47  ;;  %v704_v22 = vpop.f32.mrb[15].mxu0 }
 0x26a   :  { %v2237_v40 = vmul.f32 -1.442695, %v753_v60  ;;  %v705_v42 = vadd.f32 %v704_v22, %v4384_v47  ;;  %v4400_v9 = vpop.f32.mrb[12].mxu1 }
 0x26b   :  { %3532 = vpow2.f32 %v2238_v17  ;;  %v774_v0 = vadd.f32 %v710_v16, %v4292_v41  ;;  %v4403_v11 = vpop.f32.mrb[13].mxu1 }
 0x26c   :  { %3534 = vpow2.f32 %v2237_v40  ;;  %v773_v50 = vadd.f32 %v705_v42, %v4290_v39 }
 0x26d   :  { %v3525_v54 = vpop.eup %3524  ;;  %v2240_v53 = vmul.f32 -1.442695, %v774_v0 }
 0x26e   :  { %v3527_v57 = vpop.eup %3526  ;;  %v722_v58 = vadd.f32 1.0, %v3525_v54  ;;  %v2239_v12 = vmul.f32 -1.442695, %v773_v50 }
 0x26f   :  { %v721_v13 = vadd.f32 1.0, %v3527_v57  ;;  %3536 = vpow2.f32 %v2240_v53 }
 0x270   :  { %3538 = vrcp.f32 %v722_v58 }
 0x271   :  { %v3529_v60 = vpop.eup %3528  ;;  %3540 = vrcp.f32 %v721_v13 }
 0x272   :  { %v3531_v22 = vpop.eup %3530  ;;  %v742_v47 = vadd.f32 1.0, %v3529_v60  ;;  %3542 = vpow2.f32 %v2239_v12 }
 0x273   :  { %v741_v17 = vadd.f32 1.0, %v3531_v22 }
 0x274   :  { %3544 = vrcp.f32 %v742_v47 }
 0x275   :  { %v3533_v16 = vpop.eup %3532  ;;  %3546 = vrcp.f32 %v741_v17 }
 0x276   :  { %v3535_v40 = vpop.eup %3534  ;;  %v762_v41 = vadd.f32 1.0, %v3533_v16 }
 0x277   :  { %v761_v42 = vadd.f32 1.0, %v3535_v40 }
 0x278   :  { %3548 = vrcp.f32 %v762_v41 }
 0x279   :  { %v3537_v0 = vpop.eup %3536  ;;  %3550 = vrcp.f32 %v761_v42 }
 0x27a   :  { %v3539_v54 = vpop.eup %3538  ;;  %v782_v50 = vadd.f32 1.0, %v3537_v0 }
 0x27b   :  { %v3541_v57 = vpop.eup %3540  ;;  %v730_v53 = vmul.f32 %v3539_v54, %v4298_v46 }
 0x27c   :  { %v3543_v58 = vpop.eup %3542  ;;  %3552 = vrcp.f32 %v782_v50  ;;  %v729_v13 = vmul.f32 %v3541_v57, %v4300_v48 }
 0x27d   :  { %v781_v12 = vadd.f32 1.0, %v3543_v58 }
 0x27e   :  { %v3545_v60 = vpop.eup %3544 }
 0x27f   :  { %v3547_v47 = vpop.eup %3546  ;;  %v750_v22 = vmul.f32 %v3545_v60, %v4304_v49  ;;  %3554 = vrcp.f32 %v781_v12 }
 0x280   :  { %v749_v17 = vmul.f32 %v3547_v47, %v4308_v51  ;;  %v317_v47 = vld [vmem:[%s4762_s12] sm:$0x1] }
 0x281   :  { %v752_v41 = vadd.f32 %v750_v22, %v730_v53 }
 0x282   :  { %v3549_v16 = vpop.eup %3548  ;;  %v751_v40 = vadd.f32 %v749_v17, %v729_v13  ;;  %v318_v17 = vunpack.c.l.bf16 %v317_v47 }
 0x283   :  { %v3551_v42 = vpop.eup %3550  ;;  %v770_v0 = vmul.f32 %v3549_v16, %v4318_v56 }
 0x284   :  { %v769_v46 = vmul.f32 %v3551_v42, %v4321_v59  ;;  %v322_v16 = vrot.slane %v318_v17, %v4381_v44 }
 0x285   :  { %v772_v54 = vadd.f32 %v770_v0, %v752_v41 }
 0x286   :  { %v3553_v50 = vpop.eup %3552  ;;  %v771_v39 = vadd.f32 %v769_v46, %v751_v40 }
 0x287   :  { %v790_v48 = vmul.f32 %v3553_v50, %v4326_v61 }
 0x289   :  { %v3555_v57 = vpop.eup %3554  ;;  %v792_v58 = vadd.f32 %v790_v48, %v772_v54 }
 0x28a   :  { %v789_v49 = vmul.f32 %v3555_v57, %v4331_v63  ;;  %v4452_v57 = vpop.permute.xlu0 %971 }
 0x28c   :  { %v791_v12 = vadd.f32 %v789_v49, %v771_v39  ;;  %v189_v39 = vld [vmem:[#allocation8] sm:$0x1] }
 0x28d   :  { %v190_v51 = vunpack.c.l.bf16 %v189_v39 }
 0x28e   :  { %2854 = vmatprep.mubr.f32.mxu0 %v791_v12 }
 0x28f   :  { %2855 = vmatmul.mubr.f32.vlgmr.msra.gmra.mrb[16].mxu0 %v792_v58  ;;  %v194_v56 = vrot.slane %v190_v51, %v4381_v44 }
 0x290   :  { %3300 = vmatpush3.bf16.msra.mxu0 %v4151_v10 }
 0x291   :  { %3302 = vmatprep.subr.bf16.mxu0 %v4183_v18  ;;  %v4431_v59 = vadd.f32 %v4296_v45, %v194_v56  ;;  %v4434_v61 = vadd.f32 %v4294_v43, %v194_v56 }
 0x293   :  { %v869_v63 = vadd.f32 %v4400_v9, %v4431_v59  ;;  %v868_v53 = vadd.f32 %v4403_v11, %v4434_v61  ;;  %v4445_v9 = vadd.f32 %v4316_v55, %v322_v16  ;;  %v4448_v11 = vadd.f32 %v4310_v52, %v322_v16 }
 0x294   :  { %3304 = vmatpush3.bf16.msra.mxu0 %v4183_v18 }
 0x295   :  { %3306 = vmatprep.subr.bf16.mxu0 %v4243_v31  ;;  %v2242_v13 = vmul.f32 -1.442695, %v869_v63  ;;  %v2241_v60 = vmul.f32 -1.442695, %v868_v53  ;;  %v4456_v53 = vpop.permute.xlu0 %976 }
 0x297   :  { %3556 = vpow2.f32 %v2242_v13 }
 0x298   :  { %3308 = vmatpush3.bf16.msra.mxu0 %v4243_v31  ;;  %3558 = vpow2.f32 %v2241_v60 }
 0x299   :  { %3310 = vmatprep.subr.bf16.mxu0 %v4253_v33 }
 0x29c   :  { %3312 = vmatpush3.bf16.msra.mxu0 %v4253_v33 }
 0x29d   :  { %3314 = vmatprep.subr.bf16.mxu0 %v4265_v35 }
 0x2a0   :  { %3316 = vmatpush3.bf16.msra.mxu0 %v4265_v35 }
 0x2a1   :  { %3318 = vmatprep.subr.bf16.mxu0 %v4272_v36  ;;  %v3557_v22 = vpop.eup %3556 }
 0x2a2   :  { %v3559_v45 = vpop.eup %3558  ;;  %v877_v41 = vadd.f32 1.0, %v3557_v22 }
 0x2a3   :  { %v876_v43 = vadd.f32 1.0, %v3559_v45 }
 0x2a4   :  { %3320 = vmatpush3.bf16.msra.mxu0 %v4272_v36  ;;  %3560 = vrcp.f32 %v877_v41 }
 0x2a5   :  { %3322 = vmatprep.subr.bf16.mxu0 %v4279_v37  ;;  %3562 = vrcp.f32 %v876_v43 }
 0x2a8   :  { %3324 = vmatpush3.bf16.msra.mxu0 %v4279_v37 }
 0x2a9   :  { %3326 = vmatprep.subr.bf16.mxu0 %v4286_v38 }
 0x2ac   :  { %3328 = vmatpush3.bf16.msra.mxu0 %v4286_v38 }
 0x2ae   :  { %v3561_v54 = vpop.eup %3560 }
 0x2af   :  { %v3563_v50 = vpop.eup %3562  ;;  %v962_v48 = vsub.f32 1.0, %v3561_v54 }
 0x2b0   :  { %v961_v58 = vsub.f32 1.0, %v3563_v50 }
 0x2b1   :  { %v964_v12 = vmul.f32 %v962_v48, %v4329_v62  ;;  %v4805_v48 = vld [vmem:[#allocation25_spill] sm:$0xff] }
 0x2b2   :  { %v963_v39 = vmul.f32 %v961_v58, %v4334_v1  ;;  %v4806_v58 = vld [vmem:[#allocation26_spill] sm:$0xff] }
 0x362   :  { %v2856_v40 = vpop.f32.mrb[16].mxu0 }
 0x363   :  { %v958_v42 = vadd.f32 %v2856_v40, %v4445_v9  ;;  %v948_v0 = vpop.f32.mrb[17].mxu0 }
 0x364   :  { %v957_v46 = vadd.f32 %v948_v0, %v4448_v11 }
 0x365   :  { %3564 = vtanh.f32 %v958_v42 }
 0x366   :  { %3566 = vtanh.f32 %v957_v46 }
 0x36f   :  { %v3565_v49 = vpop.eup %3564 }
 0x370   :  { %v3567_v55 = vpop.eup %3566  ;;  %v966_v52 = vmul.f32 %v3565_v49, %v3561_v54 }
 0x371   :  { %v965_v51 = vmul.f32 %v3567_v55, %v3563_v50  ;;  %v4807_v55 = vld [vmem:[#allocation28_spill] sm:$0xff] }
 0x372   :  { %v968_v56 = vadd.f32 %v966_v52, %v964_v12 }
 0x373   :  { %v967_v63 = vadd.f32 %v965_v51, %v963_v39  ;;  %v4808_v39 = vld [vmem:[#allocation24_spill] sm:$0xff] }
 0x374   :  { %v980_v13 = vmul.f32 %v4456_v53, %v968_v56  ;;  %v4809_v56 = vld [vmem:[#allocation23_spill] sm:$0xff] }
 0x375   :  { %v979_v60 = vmul.f32 %v4452_v57, %v967_v63 }
 0x377   :  { %v3261_v47 = vpack.c.bf16 %v980_v13, %v979_v60 }
 0x379   :  { %3262 = vmatprep.subr.bf16.mxu1 %v3261_v47 }
 0x37a   :  { %3264 = vmatpush3.bf16.msra.mxu1 %v3261_v47 }
 0x37b   :  { %3266 = vmatprep.subr.bf16.mxu1 %v4189_v20 }
 0x37d   :  { %2862 = vmatmul.mubr.msk.f32.vlgmr.msra.gmra.mrb[14].mxu1 %vm474_vm3, %v4168_v14 }
 0x37e   :  { %2864 = vmatprep.mubr.msk.f32.mxu1 %vm474_vm3, %v4170_v15  ;;  %3268 = vmatpush3.bf16.msra.mxu1 %v4189_v20 }
 0x37f   :  { %3270 = vmatprep.subr.bf16.mxu1 %v4205_v24 }
 0x381   :  { %2865 = vmatmul.mubr.msk.f32.gmra.mrb[16].mxu1 %vm474_vm3, %v4187_v19 }
 0x382   :  { %2867 = vmatprep.mubr.msk.f32.mxu1 %vm474_vm3, %v4193_v21  ;;  %3272 = vmatpush3.bf16.msra.mxu1 %v4205_v24 }
 0x383   :  { %3274 = vmatprep.subr.bf16.mxu1 %v4219_v27 }
 0x385   :  { %2868 = vmatmul.mubr.msk.f32.gmra.mrb[18].mxu1 %vm474_vm3, %v4203_v23 }
 0x386   :  { %2870 = vmatprep.mubr.msk.f32.mxu1 %vm474_vm3, %v4209_v25  ;;  %3276 = vmatpush3.bf16.msra.mxu1 %v4219_v27 }
 0x387   :  { %3278 = vmatprep.subr.bf16.mxu1 %v4227_v28 }
 0x389   :  { %2871 = vmatmul.mubr.msk.f32.gmra.mrb[20].mxu1 %vm474_vm3, %v4217_v26 }
 0x38a   :  { %3280 = vmatpush3.bf16.msra.mxu1 %v4227_v28 }
 0x38b   :  { %3282 = vmatprep.subr.bf16.mxu1 %v4231_v29 }
 0x38e   :  { %3284 = vmatpush3.bf16.msra.mxu1 %v4231_v29 }
 0x38f   :  { %3286 = vmatprep.subr.bf16.mxu1 %v4235_v30 }
 0x392   :  { %3288 = vmatpush3.bf16.msra.mxu1 %v4235_v30 }
 0x393   :  { %3290 = vmatprep.subr.bf16.mxu1 %v4247_v32 }
 0x396   :  { %3292 = vmatpush3.bf16.msra.mxu1 %v4247_v32 }
 0x397   :  { %3294 = vmatprep.subr.bf16.mxu1 %v4255_v34 }
 0x39a   :  { %3296 = vmatpush3.bf16.msra.mxu1 %v4255_v34 }
 0x39b   :  { %3330 = vmatprep.subr.bf16.mxu1 %v4342_v2 }
 0x450   :  { %v4491_v62 = vpop.f32.mrb[14].mxu1 }
 0x451   :  { %v4493_v1 = vpop.f32.mrb[15].mxu1 }
 0x452   :  { %2905 = vmatprep.mubr.f32.mxu1 %v4493_v1 }
 0x453   :  { %2906 = vmatmul.mubr.f32.vlgmr.msra.gmra.mrb[22].mxu1 %v4491_v62 }
 0x454   :  { %v4497_v22 = vpop.f32.mrb[16].mxu1  ;;  %3332 = vmatpush3.bf16.msra.mxu1 %v4342_v2 }
 0x455   :  { %v1226_v45 = vadd.f32 %v4497_v22, %v4491_v62  ;;  %v4502_v17 = vpop.f32.mrb[17].mxu1  ;;  %3334 = vmatprep.subr.bf16.mxu1 %v4346_v3 }
 0x456   :  { %v1225_v41 = vadd.f32 %v4502_v17, %v4493_v1  ;;  %2908 = vmatprep.mubr.f32.mxu1 %v4502_v17 }
 0x457   :  { %2909 = vmatmul.mubr.f32.gmra.mrb[24].mxu1 %v4497_v22 }
 0x458   :  { %v4509_v43 = vpop.f32.mrb[18].mxu1  ;;  %3336 = vmatpush3.bf16.msra.mxu1 %v4346_v3 }
 0x459   :  { %v1246_v16 = vadd.f32 %v4509_v43, %v1226_v45  ;;  %v4513_v40 = vpop.f32.mrb[19].mxu1  ;;  %3338 = vmatprep.subr.bf16.mxu1 %v4350_v4 }
 0x45a   :  { %v1245_v42 = vadd.f32 %v1225_v41, %v4513_v40  ;;  %2911 = vmatprep.mubr.f32.mxu1 %v4513_v40 }
 0x45b   :  { %2912 = vmatmul.mubr.f32.gmra.mrb[26].mxu1 %v4509_v43 }
 0x45c   :  { %v4519_v0 = vpop.f32.mrb[20].mxu1  ;;  %3340 = vmatpush3.bf16.msra.mxu1 %v4350_v4 }
 0x45d   :  { %v4523_v46 = vadd.f32 %v4519_v0, %v1246_v16  ;;  %v4525_v54 = vpop.f32.mrb[21].mxu1  ;;  %3342 = vmatprep.subr.bf16.mxu1 %v4354_v5 }
 0x45e   :  { %v4529_v50 = vadd.f32 %v1245_v42, %v4525_v54  ;;  %2914 = vmatprep.mubr.f32.mxu1 %v4525_v54 }
 0x45f   :  { %2915 = vmatmul.mubr.f32.gmra.mrb[28].mxu1 %v4519_v0 }
 0x460   :  { %2949 = vmatprep.mubr.f32.mxu0 %v4529_v50  ;;  %3344 = vmatpush3.bf16.msra.mxu1 %v4354_v5 }
 0x461   :  { %2950 = vmatmul.mubr.f32.vlgmr.msra.gmra.mrb[18].mxu0 %v4523_v46  ;;  %3346 = vmatprep.subr.bf16.mxu1 %v4358_v6 }
 0x462   :  { %2991 = vmatprep.mubr.msk.f32.mxu0 %vm474_vm3, %v4143_v8 }
 0x464   :  { %3348 = vmatpush3.bf16.msra.mxu1 %v4358_v6 }
 0x465   :  { %3350 = vmatprep.subr.bf16.mxu1 %v4361_v7 }
 0x468   :  { %3352 = vmatpush3.bf16.msra.mxu1 %v4361_v7 }
 0x469   :  { %3354 = vmatprep.subr.bf16.mxu1 %v4805_v48 }
 0x46c   :  { %3356 = vmatpush3.bf16.msra.mxu1 %v4805_v48 }
 0x46d   :  { %3358 = vmatprep.subr.bf16.mxu1 %v4806_v58 }
 0x470   :  { %3360 = vmatpush3.bf16.msra.mxu1 %v4806_v58 }
 0x471   :  { %3398 = vmatprep.subr.bf16.mxu1 %v4151_v10 }
 0x526   :  { %v2907_v49 = vpop.f32.mrb[22].mxu1 }
 0x527   :  { %v1158_v12 = vadd.f32 %v2907_v49, %v4807_v55  ;;  %v1152_v8 = vpop.f32.mrb[23].mxu1 }
 0x528   :  { %v1153_v52 = vadd.f32 %v1152_v8, %v4807_v55 }
 0x529   :  { %v1192_v51 = vadd.f32 %v1158_v12, %v4808_v39 }
 0x52a   :  { %v1191_v63 = vadd.f32 %v1153_v52, %v4809_v56  ;;  %v2910_v13 = vpop.f32.mrb[24].mxu1 }
 0x52b   :  { %v2252_v60 = vmul.f32 -1.442695, %v1192_v51  ;;  %v1168_v47 = vadd.f32 %v2910_v13, %v4807_v55  ;;  %v1162_v45 = vpop.f32.mrb[25].mxu1 }
 0x52c   :  { %v2251_v41 = vmul.f32 -1.442695, %v1191_v63  ;;  %v1163_v16 = vadd.f32 %v1162_v45, %v4807_v55 }
 0x52d   :  { %3568 = vpow2.f32 %v2252_v60  ;;  %v1212_v42 = vadd.f32 %v1168_v47, %v4808_v39 }
 0x52e   :  { %3570 = vpow2.f32 %v2251_v41  ;;  %v1211_v49 = vadd.f32 %v1163_v16, %v4809_v56  ;;  %v2913_v44 = vpop.f32.mrb[26].mxu1 }
 0x52f   :  { %v2254_v8 = vmul.f32 -1.442695, %v1212_v42  ;;  %v1178_v12 = vadd.f32 %v2913_v44, %v4807_v55  ;;  %v1172_v58 = vpop.f32.mrb[27].mxu1 }
 0x530   :  { %v2253_v52 = vmul.f32 -1.442695, %v1211_v49  ;;  %v1173_v51 = vadd.f32 %v1172_v58, %v4807_v55 }
 0x531   :  { %3572 = vpow2.f32 %v2254_v8  ;;  %v1232_v13 = vadd.f32 %v1178_v12, %v4808_v39 }
 0x532   :  { %3574 = vpow2.f32 %v2253_v52  ;;  %v1231_v63 = vadd.f32 %v1173_v51, %v4809_v56  ;;  %v2916_v60 = vpop.f32.mrb[28].mxu1 }
 0x533   :  { %v2256_v45 = vmul.f32 -1.442695, %v1232_v13  ;;  %v1188_v47 = vadd.f32 %v2916_v60, %v4807_v55  ;;  %v1182_v41 = vpop.f32.mrb[29].mxu1 }
 0x534   :  { %v2255_v16 = vmul.f32 -1.442695, %v1231_v63  ;;  %v1183_v42 = vadd.f32 %v1182_v41, %v4807_v55  ;;  %v4561_v48 = vpop.f32.mrb[18].mxu0 }
 0x535   :  { %3576 = vpow2.f32 %v2256_v45  ;;  %v1252_v44 = vadd.f32 %v1188_v47, %v4808_v39  ;;  %v4564_v58 = vpop.f32.mrb[19].mxu0 }
 0x536   :  { %3578 = vpow2.f32 %v2255_v16  ;;  %v1251_v49 = vadd.f32 %v1183_v42, %v4809_v56 }
 0x537   :  { %v3569_v8 = vpop.eup %3568  ;;  %v2258_v12 = vmul.f32 -1.442695, %v1252_v44 }
 0x538   :  { %v3571_v52 = vpop.eup %3570  ;;  %v1200_v51 = vadd.f32 1.0, %v3569_v8  ;;  %v2257_v13 = vmul.f32 -1.442695, %v1251_v49 }
 0x539   :  { %v1199_v60 = vadd.f32 1.0, %v3571_v52  ;;  %3580 = vpow2.f32 %v2258_v12 }
 0x53a   :  { %3582 = vrcp.f32 %v1200_v51 }
 0x53b   :  { %v3573_v63 = vpop.eup %3572  ;;  %3584 = vrcp.f32 %v1199_v60 }
 0x53c   :  { %v3575_v41 = vpop.eup %3574  ;;  %v1220_v55 = vadd.f32 1.0, %v3573_v63  ;;  %3586 = vpow2.f32 %v2257_v13 }
 0x53d   :  { %v1219_v45 = vadd.f32 1.0, %v3575_v41 }
 0x53e   :  { %3588 = vrcp.f32 %v1220_v55 }
 0x53f   :  { %v3577_v47 = vpop.eup %3576  ;;  %3590 = vrcp.f32 %v1219_v45 }
 0x540   :  { %v3579_v16 = vpop.eup %3578  ;;  %v1240_v39 = vadd.f32 1.0, %v3577_v47 }
 0x541   :  { %v1239_v42 = vadd.f32 1.0, %v3579_v16 }
 0x542   :  { %3592 = vrcp.f32 %v1240_v39 }
 0x543   :  { %v3581_v44 = vpop.eup %3580  ;;  %3594 = vrcp.f32 %v1239_v42 }
 0x544   :  { %v3583_v8 = vpop.eup %3582  ;;  %v1260_v49 = vadd.f32 1.0, %v3581_v44 }
 0x545   :  { %v3585_v52 = vpop.eup %3584  ;;  %v1208_v12 = vmul.f32 %v3583_v8, %v4491_v62 }
 0x546   :  { %v3587_v51 = vpop.eup %3586  ;;  %3596 = vrcp.f32 %v1260_v49  ;;  %v1207_v60 = vmul.f32 %v3585_v52, %v4493_v1 }
 0x547   :  { %v1259_v13 = vadd.f32 1.0, %v3587_v51 }
 0x548   :  { %v3589_v63 = vpop.eup %3588 }
 0x549   :  { %v3591_v55 = vpop.eup %3590  ;;  %v1228_v41 = vmul.f32 %v3589_v63, %v4497_v22  ;;  %3598 = vrcp.f32 %v1259_v13 }
 0x54a   :  { %v1227_v45 = vmul.f32 %v3591_v55, %v4502_v17 }
 0x54b   :  { %v1230_v39 = vadd.f32 %v1228_v41, %v1208_v12 }
 0x54c   :  { %v3593_v47 = vpop.eup %3592  ;;  %v1229_v16 = vadd.f32 %v1227_v45, %v1207_v60 }
 0x54d   :  { %v3595_v42 = vpop.eup %3594  ;;  %v1248_v44 = vmul.f32 %v3593_v47, %v4509_v43 }
 0x54e   :  { %v1247_v62 = vmul.f32 %v3595_v42, %v4513_v40 }
 0x54f   :  { %v1250_v8 = vadd.f32 %v1248_v44, %v1230_v39 }
 0x550   :  { %v3597_v49 = vpop.eup %3596  ;;  %v1249_v56 = vadd.f32 %v1247_v62, %v1229_v16  ;;  %v4814_v62 = vld [vmem:[#allocation24_spill] sm:$0xff] }
 0x551   :  { %v1268_v1 = vmul.f32 %v3597_v49, %v4519_v0  ;;  %v4815_v49 = vld [vmem:[#allocation23_spill] sm:$0xff] }
 0x553   :  { %v3599_v52 = vpop.eup %3598  ;;  %v1270_v51 = vadd.f32 %v1268_v1, %v1250_v8 }
 0x554   :  { %v1267_v22 = vmul.f32 %v3599_v52, %v4525_v54 }
 0x556   :  { %v1269_v13 = vadd.f32 %v1267_v22, %v1249_v56 }
 0x558   :  { %2984 = vmatprep.mubr.f32.mxu1 %v1269_v13 }
 0x559   :  { %2985 = vmatmul.mubr.f32.vlgmr.msra.gmra.mrb[30].mxu1 %v1270_v51 }
 0x55a   :  { %3400 = vmatpush3.bf16.msra.mxu1 %v4151_v10  ;;  %v1347_v10 = vadd.f32 %v4561_v48, %v4431_v59 }
 0x55b   :  { %3402 = vmatprep.subr.bf16.mxu1 %v4183_v18 }
 0x55e   :  { %3404 = vmatpush3.bf16.msra.mxu1 %v4183_v18  ;;  %v1346_v18 = vadd.f32 %v4564_v58, %v4434_v61 }
 0x55f   :  { %3406 = vmatprep.subr.bf16.mxu1 %v4243_v31 }
 0x562   :  { %3408 = vmatpush3.bf16.msra.mxu1 %v4243_v31  ;;  %v2260_v31 = vmul.f32 -1.442695, %v1347_v10 }
 0x563   :  { %3410 = vmatprep.subr.bf16.mxu1 %v4253_v33 }
 0x564   :  { %3600 = vpow2.f32 %v2260_v31 }
 0x566   :  { %3412 = vmatpush3.bf16.msra.mxu1 %v4253_v33  ;;  %v2259_v33 = vmul.f32 -1.442695, %v1346_v18 }
 0x567   :  { %3414 = vmatprep.subr.bf16.mxu1 %v4265_v35 }
 0x568   :  { %3602 = vpow2.f32 %v2259_v33 }
 0x56a   :  { %3416 = vmatpush3.bf16.msra.mxu1 %v4265_v35 }
 0x56b   :  { %3418 = vmatprep.subr.bf16.mxu1 %v4272_v36 }
 0x56e   :  { %3420 = vmatpush3.bf16.msra.mxu1 %v4272_v36  ;;  %v3601_v35 = vpop.eup %3600 }
 0x56f   :  { %3422 = vmatprep.subr.bf16.mxu1 %v4279_v37  ;;  %v1355_v17 = vadd.f32 1.0, %v3601_v35 }
 0x571   :  { %3604 = vrcp.f32 %v1355_v17 }
 0x572   :  { %3424 = vmatpush3.bf16.msra.mxu1 %v4279_v37  ;;  %v3603_v36 = vpop.eup %3602 }
 0x573   :  { %3426 = vmatprep.subr.bf16.mxu1 %v4286_v38  ;;  %v1354_v43 = vadd.f32 1.0, %v3603_v36 }
 0x575   :  { %3606 = vrcp.f32 %v1354_v43 }
 0x576   :  { %3428 = vmatpush3.bf16.msra.mxu1 %v4286_v38 }
 0x57b   :  { %v3605_v54 = vpop.eup %3604 }
 0x57c   :  { %v1440_v56 = vsub.f32 1.0, %v3605_v54 }
 0x57e   :  { %v1442_v63 = vmul.f32 %v1440_v56, %v4523_v46 }
 0x57f   :  { %v3607_v48 = vpop.eup %3606 }
 0x580   :  { %v1439_v58 = vsub.f32 1.0, %v3607_v48 }
 0x582   :  { %v1441_v41 = vmul.f32 %v1439_v58, %v4529_v50 }
 0x62c   :  { %v2986_v37 = vpop.f32.mrb[30].mxu1 }
 0x62d   :  { %v1436_v40 = vadd.f32 %v2986_v37, %v4445_v9  ;;  %v1426_v38 = vpop.f32.mrb[31].mxu1 }
 0x62e   :  { %v1435_v0 = vadd.f32 %v1426_v38, %v4448_v11 }
 0x62f   :  { %3608 = vtanh.f32 %v1436_v40 }
 0x630   :  { %3610 = vtanh.f32 %v1435_v0 }
 0x639   :  { %v3609_v12 = vpop.eup %3608 }
 0x63a   :  { %v3611_v60 = vpop.eup %3610  ;;  %v1444_v55 = vmul.f32 %v3609_v12, %v3605_v54 }
 0x63b   :  { %v1443_v45 = vmul.f32 %v3611_v60, %v3607_v48 }
 0x63c   :  { %v1446_v39 = vadd.f32 %v1444_v55, %v1442_v63 }
 0x63d   :  { %v1445_v47 = vadd.f32 %v1443_v45, %v1441_v41 }
 0x63e   :  { %v1448_v16 = vmul.f32 %v1446_v39, %v4456_v53 }
 0x63f   :  { %v1447_v42 = vmul.f32 %v1445_v47, %v4452_v57 }
 0x641   :  { %v3361_v44 = vpack.c.bf16 %v1448_v16, %v1447_v42 }
 0x643   :  { %3362 = vmatprep.subr.bf16.mxu0 %v3361_v44 }
 0x644   :  { %3364 = vmatpush3.bf16.msra.mxu0 %v3361_v44 }
 0x645   :  { %3366 = vmatprep.subr.bf16.mxu0 %v4189_v20 }
 0x647   :  { %2992 = vmatmul.mubr.msk.f32.vlgmr.msra.gmra.mrb[20].mxu0 %vm474_vm3, %v4168_v14 }
 0x648   :  { %2994 = vmatprep.mubr.msk.f32.mxu0 %vm474_vm3, %v4170_v15  ;;  %3368 = vmatpush3.bf16.msra.mxu0 %v4189_v20 }
 0x649   :  { %3370 = vmatprep.subr.bf16.mxu0 %v4205_v24 }
 0x64b   :  { %2995 = vmatmul.mubr.msk.f32.gmra.mrb[22].mxu0 %vm474_vm3, %v4187_v19 }
 0x64c   :  { %2997 = vmatprep.mubr.msk.f32.mxu0 %vm474_vm3, %v4193_v21  ;;  %3372 = vmatpush3.bf16.msra.mxu0 %v4205_v24 }
 0x64d   :  { %3374 = vmatprep.subr.bf16.mxu0 %v4219_v27 }
 0x64f   :  { %2998 = vmatmul.mubr.msk.f32.gmra.mrb[24].mxu0 %vm474_vm3, %v4203_v23 }
 0x650   :  { %3000 = vmatprep.mubr.msk.f32.mxu0 %vm474_vm3, %v4209_v25  ;;  %3376 = vmatpush3.bf16.msra.mxu0 %v4219_v27 }
 0x651   :  { %3378 = vmatprep.subr.bf16.mxu0 %v4227_v28 }
 0x653   :  { %3001 = vmatmul.mubr.msk.f32.gmra.mrb[26].mxu0 %vm474_vm3, %v4217_v26 }
 0x654   :  { %3380 = vmatpush3.bf16.msra.mxu0 %v4227_v28 }
 0x655   :  { %3382 = vmatprep.subr.bf16.mxu0 %v4231_v29 }
 0x658   :  { %3384 = vmatpush3.bf16.msra.mxu0 %v4231_v29 }
 0x659   :  { %3386 = vmatprep.subr.bf16.mxu0 %v4235_v30 }
 0x65c   :  { %3388 = vmatpush3.bf16.msra.mxu0 %v4235_v30 }
 0x65d   :  { %3390 = vmatprep.subr.bf16.mxu0 %v4247_v32 }
 0x660   :  { %3392 = vmatpush3.bf16.msra.mxu0 %v4247_v32 }
 0x661   :  { %3394 = vmatprep.subr.bf16.mxu0 %v4255_v34 }
 0x664   :  { %3396 = vmatpush3.bf16.msra.mxu0 %v4255_v34  ;;  %v4810_v34 = vld [vmem:[#allocation25_spill] sm:$0xff] }
 0x665   :  { %3430 = vmatprep.subr.bf16.mxu0 %v4342_v2 }
 0x71a   :  { %v4631_v14 = vpop.f32.mrb[20].mxu0 }
 0x71b   :  { %v4633_v15 = vpop.f32.mrb[21].mxu0 }
 0x71c   :  { %3035 = vmatprep.mubr.f32.mxu0 %v4633_v15 }
 0x71d   :  { %3036 = vmatmul.mubr.f32.vlgmr.msra.gmra.mrb[28].mxu0 %v4631_v14 }
 0x71e   :  { %v4637_v19 = vpop.f32.mrb[22].mxu0  ;;  %3432 = vmatpush3.bf16.msra.mxu0 %v4342_v2  ;;  %v4811_v2 = vld [vmem:[#allocation26_spill] sm:$0xff] }
 0x71f   :  { %v1694_v20 = vadd.f32 %v4637_v19, %v4631_v14  ;;  %v4642_v21 = vpop.f32.mrb[23].mxu0  ;;  %3434 = vmatprep.subr.bf16.mxu0 %v4346_v3 }
 0x720   :  { %v1693_v23 = vadd.f32 %v4642_v21, %v4633_v15  ;;  %3038 = vmatprep.mubr.f32.mxu0 %v4642_v21 }
 0x721   :  { %3039 = vmatmul.mubr.f32.gmra.mrb[30].mxu0 %v4637_v19 }
 0x722   :  { %v4649_v24 = vpop.f32.mrb[24].mxu0  ;;  %3436 = vmatpush3.bf16.msra.mxu0 %v4346_v3  ;;  %v4812_v3 = vmov 0.0  }
 0x723   :  { %v1714_v25 = vadd.f32 %v4649_v24, %v1694_v20  ;;  %v4653_v26 = vpop.f32.mrb[25].mxu0  ;;  %3438 = vmatprep.subr.bf16.mxu0 %v4350_v4 }
 0x724   :  { %v1713_v27 = vadd.f32 %v1693_v23, %v4653_v26  ;;  %3041 = vmatprep.mubr.f32.mxu0 %v4653_v26 }
 0x725   :  { %3042 = vmatmul.mubr.f32.gmra.mrb[32].mxu0 %v4649_v24 }
 0x726   :  { %v4659_v28 = vpop.f32.mrb[26].mxu0  ;;  %3440 = vmatpush3.bf16.msra.mxu0 %v4350_v4 }
 0x727   :  { %v4663_v29 = vadd.f32 %v4659_v28, %v1714_v25  ;;  %v4665_v30 = vpop.f32.mrb[27].mxu0  ;;  %3442 = vmatprep.subr.bf16.mxu0 %v4354_v5 }
 0x728   :  { %v4669_v32 = vadd.f32 %v1713_v27, %v4665_v30  ;;  %3044 = vmatprep.mubr.f32.mxu0 %v4665_v30 }
 0x729   :  { %3045 = vmatmul.mubr.f32.gmra.mrb[34].mxu0 %v4659_v28 }
 0x72a   :  { %3079 = vmatprep.mubr.f32.mxu1 %v4669_v32  ;;  %3444 = vmatpush3.bf16.msra.mxu0 %v4354_v5  ;;  %v4813_v5 = vld [vmem:[#allocation28_spill] sm:$0xff] }
 0x72b   :  { %3080 = vmatmul.mubr.f32.vlgmr.msra.gmra.mrb[32].mxu1 %v4663_v29  ;;  %3446 = vmatprep.subr.bf16.mxu0 %v4358_v6 }
 0x72e   :  { %3448 = vmatpush3.bf16.msra.mxu0 %v4358_v6 }
 0x72f   :  { %3450 = vmatprep.subr.bf16.mxu0 %v4361_v7 }
 0x732   :  { %3452 = vmatpush3.bf16.msra.mxu0 %v4361_v7 }
 0x733   :  { %3454 = vmatprep.subr.bf16.mxu0 %v4810_v34 }
 0x736   :  { %3456 = vmatpush3.bf16.msra.mxu0 %v4810_v34 }
 0x737   :  { %3458 = vmatprep.subr.bf16.mxu0 %v4811_v2 }
 0x73a   :  { %3460 = vmatpush3.bf16.msra.mxu0 %v4811_v2 }
 0x73b   :  { %3159 = vmatprep.subr.bf16.mxu0 %v4812_v3 }
 0x7f0   :  { %v3037_v4 = vpop.f32.mrb[28].mxu0 }
 0x7f1   :  { %v1626_v46 = vadd.f32 %v3037_v4, %v4813_v5  ;;  %v1620_v50 = vpop.f32.mrb[29].mxu0 }
 0x7f2   :  { %v1621_v6 = vadd.f32 %v1620_v50, %v4813_v5 }
 0x7f3   :  { %v1660_v8 = vadd.f32 %v1626_v46, %v4814_v62 }
 0x7f4   :  { %v1659_v7 = vadd.f32 %v1621_v6, %v4815_v49  ;;  %v3040_v1 = vpop.f32.mrb[30].mxu0 }
 0x7f5   :  { %v2270_v52 = vmul.f32 -1.442695, %v1660_v8  ;;  %v1636_v51 = vadd.f32 %v3040_v1, %v4813_v5  ;;  %v1630_v22 = vpop.f32.mrb[31].mxu0 }
 0x7f6   :  { %v2269_v13 = vmul.f32 -1.442695, %v1659_v7  ;;  %v1631_v10 = vadd.f32 %v1630_v22, %v4813_v5 }
 0x7f7   :  { %3612 = vpow2.f32 %v2270_v52  ;;  %v1680_v18 = vadd.f32 %v1636_v51, %v4814_v62 }
 0x7f8   :  { %3614 = vpow2.f32 %v2269_v13  ;;  %v1679_v31 = vadd.f32 %v1631_v10, %v4815_v49  ;;  %v3043_v33 = vpop.f32.mrb[32].mxu0 }
 0x7f9   :  { %v2272_v35 = vmul.f32 -1.442695, %v1680_v18  ;;  %v1646_v36 = vadd.f32 %v3043_v33, %v4813_v5  ;;  %v1640_v17 = vpop.f32.mrb[33].mxu0 }
 0x7fa   :  { %v2271_v43 = vmul.f32 -1.442695, %v1679_v31  ;;  %v1641_v37 = vadd.f32 %v1640_v17, %v4813_v5 }
 0x7fb   :  { %3616 = vpow2.f32 %v2272_v35  ;;  %v1700_v40 = vadd.f32 %v1646_v36, %v4814_v62 }
 0x7fc   :  { %3618 = vpow2.f32 %v2271_v43  ;;  %v1699_v38 = vadd.f32 %v1641_v37, %v4815_v49  ;;  %v3046_v0 = vpop.f32.mrb[34].mxu0 }
 0x7fd   :  { %v2274_v54 = vmul.f32 -1.442695, %v1700_v40  ;;  %v1656_v48 = vadd.f32 %v3046_v0, %v4813_v5  ;;  %v1650_v56 = vpop.f32.mrb[35].mxu0 }
 0x7fe   :  { %v2273_v58 = vmul.f32 -1.442695, %v1699_v38  ;;  %v1651_v12 = vadd.f32 %v1650_v56, %v4813_v5  ;;  %v4699_v60 = vpop.f32.mrb[32].mxu1 }
 0x7ff   :  { %3620 = vpow2.f32 %v2274_v54  ;;  %v1720_v63 = vadd.f32 %v1656_v48, %v4814_v62  ;;  %v1805_v55 = vpop.f32.mrb[33].mxu1 }
 0x800   :  { %3622 = vpow2.f32 %v2273_v58  ;;  %v1719_v41 = vadd.f32 %v1651_v12, %v4815_v49 }
 0x801   :  { %v3613_v45 = vpop.eup %3612  ;;  %v2276_v39 = vmul.f32 -1.442695, %v1720_v63 }
 0x802   :  { %v3615_v47 = vpop.eup %3614  ;;  %v1668_v16 = vadd.f32 1.0, %v3613_v45  ;;  %v2275_v42 = vmul.f32 -1.442695, %v1719_v41 }
 0x803   :  { %v1667_v44 = vadd.f32 1.0, %v3615_v47  ;;  %3624 = vpow2.f32 %v2276_v39 }
 0x804   :  { %3626 = vrcp.f32 %v1668_v16 }
 0x805   :  { %v3617_v20 = vpop.eup %3616  ;;  %3628 = vrcp.f32 %v1667_v44 }
 0x806   :  { %v3619_v23 = vpop.eup %3618  ;;  %v1688_v25 = vadd.f32 1.0, %v3617_v20  ;;  %3630 = vpow2.f32 %v2275_v42 }
 0x807   :  { %v1687_v27 = vadd.f32 1.0, %v3619_v23 }
 0x808   :  { %3632 = vrcp.f32 %v1688_v25 }
 0x809   :  { %v3621_v34 = vpop.eup %3620  ;;  %3634 = vrcp.f32 %v1687_v27 }
 0x80a   :  { %v3623_v2 = vpop.eup %3622  ;;  %v1708_v4 = vadd.f32 1.0, %v3621_v34  ;;  %v2401_v34 = vld [vmem:[#allocation14] sm:$0xff]  }
 0x80b   :  { %v1707_v5 = vadd.f32 1.0, %v3623_v2 }
 0x80c   :  { %3636 = vrcp.f32 %v1708_v4  ;;  %v2456_v4 = vld [vmem:[#allocation14 + $0x8] sm:$0xff]  }
 0x80d   :  { %v3625_v46 = vpop.eup %3624  ;;  %3638 = vrcp.f32 %v1707_v5  ;;  %v2461_v5 = vld [vmem:[#allocation14 + $0x30] sm:$0xff]  }
 0x80e   :  { %v3627_v50 = vpop.eup %3626  ;;  %v1728_v6 = vadd.f32 1.0, %v3625_v46  ;;  %v2462_v46 = vld [vmem:[#allocation14 + $0x38] sm:$0xff]  }
 0x80f   :  { %v3629_v62 = vpop.eup %3628  ;;  %v1676_v8 = vmul.f32 %v3627_v50, %v4631_v14  ;;  %v3523_v50 = vld [vmem:[#allocation5] sm:$0xff]  }
 0x810   :  { %v3631_v49 = vpop.eup %3630  ;;  %3640 = vrcp.f32 %v1728_v6  ;;  %v1675_v7 = vmul.f32 %v3629_v62, %v4633_v15  ;;  %v2178_v6 = vld [vmem:[%s4767_s17] sm:$0xff]  ;;  %v2179_v62 = vld [vmem:[%s4767_s17 + $0x8] sm:$0xff]  ;;  %s3879_s17 = smov [#allocation16]  }
 0x811   :  { %v1727_v1 = vadd.f32 1.0, %v3631_v49  ;;  %2182 = vperm.xlu1 %3514, %v2178_v6   ;;  %s2199_s28 = sshll.u32 %s3879_s17, 4  ;;  %s2200_s28 = int_to_ptr.vmem [resolvable:$true] %s2199_s28 }
 0x812   :  { %v3633_v52 = vpop.eup %3632  ;;  %p3837_p9 = scmp.lt.s32.totalorder %s2200_s28, %s2200_s28 }
 0x813   :  { %v3635_v51 = vpop.eup %3634  ;;  %v1696_v22 = vmul.f32 %v3633_v52, %v4637_v19  ;;  %3642 = vrcp.f32 %v1727_v1 }
 0x814   :  { %v1695_v13 = vmul.f32 %v3635_v51, %v4642_v21  ;;  %v2397_v21 = vld [vmem:[#allocation7] sm:$0xff]  }
 0x815   :  { %v1698_v10 = vadd.f32 %v1696_v22, %v1676_v8  ;;  %v2398_v0 = vunpack.c.l.bf16 %v2397_v21  ;;  %v2399_v2 = vunpack.c.h.bf16 %v2397_v21  ;;  %2187 = vperm.xlu1 %3514, %v2179_v62   ;;  %v2168_v22 = vld [vmem:[%s4765_s15] sm:$0x1]  ;;  %s3832_s15 = scalar_lea.vmem %s2200_s28, 256 }
 0x816   :  { %v3637_v18 = vpop.eup %3636  ;;  %v1697_v31 = vadd.f32 %v1695_v13, %v1675_v7  ;;  %v2169_v13 = vunpack.c.l.bf16 %v2168_v22  ;;  %p3833_p8 = scmp.ne.s32.totalorder %s2200_s28, %s3832_s15  ;;  %p3838_p10 = scmp.lt.s32.totalorder %s3832_s15, %s3832_s15 }
 0x817   :  { %v3639_v33 = vpop.eup %3638  ;;  %v1716_v35 = vmul.f32 %v3637_v18, %v4649_v24  ;;  %3121 = vmatprep.mubr.msk.f32.mxu1 %vm474_vm3, %v2398_v0  ;;  %v3522_v24 = vld [vmem:[%s4763_s13] sm:$0xff]  }
 0x818   :  { %v1715_v14 = vmul.f32 %v3639_v33, %v4653_v26  ;;  %v1815_v26 = vadd.f32 %v4699_v60, %v4431_v59  ;;  %p3839_p11 = por %p3838_p10, %p3837_p9 }
 0x819   :  { %v1718_v36 = vadd.f32 %v1716_v35, %v1698_v10  ;;  %v4816_v10 = vld [vmem:[#allocation27_spill] sm:$0xff] }
 0x81a   :  { %v3641_v17 = vpop.eup %3640  ;;  %v1717_v43 = vadd.f32 %v1715_v14, %v1697_v31  ;;  %v2173_v18 = vrot.slane %v2169_v13, %v4816_v10  ;;  %p3840_p12 = pnand %p3839_p11, %p3833_p8 }
 0x81b   :  { %v1736_v15 = vmul.f32 %v3641_v17, %v4659_v28  ;;  %v1814_v28 = vadd.f32 %v1805_v55, %v4434_v61 }
 0x81d   :  { %v3643_v37 = vpop.eup %3642  ;;  %v1738_v40 = vadd.f32 %v1736_v15, %v1718_v36  ;;  %v2277_v54 = vmul.f32 -1.442695, %v1814_v28 }
 0x81e   :  { %v1735_v19 = vmul.f32 %v3643_v37, %v4665_v30  ;;  %v2278_v30 = vmul.f32 -1.442695, %v1815_v26 }
 0x820   :  { %v1737_v38 = vadd.f32 %v1735_v19, %v1717_v43  ;;  %3644 = vpow2.f32 %v2278_v30 }
 0x821   :  { %3646 = vpow2.f32 %v2277_v54 }
 0x822   :  { %3114 = vmatprep.mubr.f32.mxu0 %v1737_v38 }
 0x823   :  { %3115 = vmatmul.mubr.f32.vlgmr.msra.gmra.mrb[36].mxu0 %v1738_v40 }
 0x824   :  { %3161 = vmatprep.mubr.msk.bf16.mxu0 %vm3877_vm0, %v4812_v3  ;;  %3160 = vmatpush3.bf16.msra.mxu0 %v3522_v24 }
 0x827   :  { %3162 = vmatmul.mubr.msk.bf16.vlgmr.msra.gmra.mrb[40].mxu0 %vm474_vm3, %v3523_v50 }
 0x82a   :  { %v3645_v48 = vpop.eup %3644 }
 0x82b   :  { %v3647_v3 = vpop.eup %3646  ;;  %v1823_v56 = vadd.f32 1.0, %v3645_v48 }
 0x82c   :  { %v1822_v58 = vadd.f32 1.0, %v3647_v3 }
 0x82d   :  { %3648 = vrcp.f32 %v1823_v56 }
 0x82e   :  { %3650 = vrcp.f32 %v1822_v58 }
 0x837   :  { %v3649_v59 = vpop.eup %3648 }
 0x838   :  { %v3651_v61 = vpop.eup %3650  ;;  %v1908_v60 = vsub.f32 1.0, %v3649_v59 }
 0x839   :  { %v1907_v55 = vsub.f32 1.0, %v3651_v61 }
 0x83a   :  { %v1910_v16 = vmul.f32 %v1908_v60, %v4663_v29  ;;  %v2457_v29 = vld [vmem:[#allocation14 + $0x10] sm:$0xff]  }
 0x83b   :  { %v1909_v44 = vmul.f32 %v1907_v55, %v4669_v32  ;;  %v2458_v32 = vld [vmem:[#allocation14 + $0x18] sm:$0xff]  }
 0x890   :  { %v2183_v31 = vpop.permute.xlu1 %2182 }
 0x894   :  { %v2188_v40 = vpop.permute.xlu1 %2187 }
 0x8f6   :  { %v3116_v12 = vpop.f32.mrb[36].mxu0 }
 0x8f7   :  { %v1904_v63 = vadd.f32 %v3116_v12, %v4445_v9  ;;  %v1894_v41 = vpop.f32.mrb[37].mxu0 }
 0x8f8   :  { %v1903_v45 = vadd.f32 %v1894_v41, %v4448_v11 }
 0x8f9   :  { %3652 = vtanh.f32 %v1904_v63 }
 0x8fa   :  { %3654 = vtanh.f32 %v1903_v45  ;;  %v2161_v7 = vpop.f32.mrb[40].mxu0 }
 0x8fb   :  { %v3163_v1 = vpop.f32.mrb[41].mxu0 }
 0x8fc   :  { %v2164_v52 = vpop.f32.mrb[42].mxu0 }
 0x8fd   :  { %v3164_v51 = vpop.f32.mrb[43].mxu0 }
 0x903   :  { %v3653_v39 = vpop.eup %3652 }
 0x904   :  { %v3655_v47 = vpop.eup %3654  ;;  %v1912_v42 = vmul.f32 %v3653_v39, %v3649_v59 }
 0x905   :  { %v1911_v20 = vmul.f32 %v3655_v47, %v3651_v61 }
 0x906   :  { %v1914_v23 = vadd.f32 %v1912_v42, %v1910_v16 }
 0x907   :  { %v1913_v25 = vadd.f32 %v1911_v20, %v1909_v44 }
 0x908   :  { %v1916_v9 = vmul.f32 %v1914_v23, %v4456_v53  ;;  %v2459_v53 = vld [vmem:[#allocation14 + $0x20] sm:$0xff]  }
 0x909   :  { %v1915_v11 = vmul.f32 %v1913_v25, %v4452_v57  ;;  %v2460_v57 = vld [vmem:[#allocation14 + $0x28] sm:$0xff]  }
 0x90b   :  { %v3461_v27 = vpack.c.bf16 %v1916_v9, %v1915_v11 }
 0x90d   :  { %3462 = vmatprep.subr.bf16.mxu1 %v3461_v27 }
 0x90e   :  { %3464 = vmatpush3.bf16.msra.mxu1 %v3461_v27 }
 0x90f   :  { %3466 = vmatprep.subr.bf16.mxu1 %v2401_v34 }
 0x911   :  { %3122 = vmatmul.mubr.msk.f32.vlgmr.msra.gmra.mrb[34].mxu1 %vm474_vm3, %v2399_v2 }
 0x912   :  { %3468 = vmatpush3.bf16.msra.mxu1 %v2401_v34 }
 0x913   :  { %3470 = vmatprep.subr.bf16.mxu1 %v2456_v4 }
 0x916   :  { %3472 = vmatpush3.bf16.msra.mxu1 %v2456_v4 }
 0x917   :  { %3474 = vmatprep.subr.bf16.mxu1 %v2457_v29 }
 0x91a   :  { %3476 = vmatpush3.bf16.msra.mxu1 %v2457_v29 }
 0x91b   :  { %3478 = vmatprep.subr.bf16.mxu1 %v2458_v32 }
 0x91e   :  { %3480 = vmatpush3.bf16.msra.mxu1 %v2458_v32 }
 0x91f   :  { %3482 = vmatprep.subr.bf16.mxu1 %v2459_v53 }
 0x922   :  { %3484 = vmatpush3.bf16.msra.mxu1 %v2459_v53 }
 0x923   :  { %3486 = vmatprep.subr.bf16.mxu1 %v2460_v57 }
 0x926   :  { %3488 = vmatpush3.bf16.msra.mxu1 %v2460_v57 }
 0x927   :  { %3490 = vmatprep.subr.bf16.mxu1 %v2461_v5 }
 0x92a   :  { %3492 = vmatpush3.bf16.msra.mxu1 %v2461_v5 }
 0x92b   :  { %3494 = vmatprep.subr.bf16.mxu1 %v2462_v46 }
 0x92e   :  { %3496 = vmatpush3.bf16.msra.mxu1 %v2462_v46 }
 0x9e4   :  { %v3123_v8 = vpop.f32.mrb[34].mxu1 }
 0x9e5   :  { %v1993_v49 = vpop.f32.mrb[35].mxu1 }
 0x9e6   :  { %3156 = vmatprep.mubr.f32.mxu1 %v1993_v49 }
 0x9e7   :  { %3157 = vmatmul.mubr.f32.vlgmr.msra.gmra.mrb[36].mxu1 %v3123_v8 }
 0xaba   :  { %v3158_v33 = vpop.f32.mrb[36].mxu1 }
 0xabb   :  { %v2165_v35 = vadd.f32 %v3158_v33, %v2164_v52  ;;  %v2104_v14 = vpop.f32.mrb[37].mxu1 }
 0xabc   :  { %v2162_v36 = vadd.f32 %v2161_v7, %v2104_v14 }
 0xabd   :  { %v2175_v17 = vadd.f32 %v2173_v18, %v2165_v35 }
 0xabe   :  { %v2174_v43 = vadd.f32 %v2173_v18, %v2162_v36 }
 0xabf   :  { %v2177_v15 = vmax.f32 %v2175_v17, 0.0 }
 0xac0   :  { %v2176_v37 = vmax.f32 %v2174_v43, 0.0 }
 0xac1   :  { %v2191_v19 = vmul.f32 %v2188_v40, %v2177_v15 }
 0xac2   :  { %v2190_v38 = vmul.f32 %v2183_v31, %v2176_v37 }
 0xac3   :  { %2193 = vst [vmem:[#allocation16 + $0x8] sm:$0xff] %v2191_v19 }
 0xac4   :  { %2192 = vst [vmem:[#allocation16] sm:$0xff] %v2190_v38 }
 0xac5   :  { %3843 = shalt.err (!%p3840_p12)
}
 0xac6   :  { %s3844_s9 = scalar_lea.hbm %s4768_s18, 256 }
 0xac7   :  { %p3845_p13 = scmp.ne.s32.totalorder %s4768_s18, %s3844_s9  ;;  %p3848_p0 = scmp.lt.u32.totalorder %s3844_s9, %s4768_s18 }
 0xac9   :  { %p3850_p1 = pnand %p3848_p0, %p3845_p13 }
 0xacb   :  { %3853 = shalt.err (!%p3850_p1)
}
 0xacc   :  { %s3880_s25 = smov 128   ;;  %s3881_s8 = smov 8  }
 0xacd   :  { %2205 = dma.vmem_to_hbm [thread:$0]  %s2200_s28, 256, %s4768_s18, [#allocation4], %s3880_s25, %s3880_s25, %s3881_s8  }
 0xace   :  { %3864 = dma.done.wait [#allocation4], 256  }
 0xacf   :  { %3865 = vsyncadd [#allocation4], 4294967040 }
 0xad0   :  { %2209 = vsyncpa [#allocation3], 1 }
 0xad1   :  { %2210 = vsyncpa [#allocation6], 1 }
 0xad2   :  { %2211 = vsyncpa [#allocation9], 1 }
 0xad3   :  { %2212 = vsyncpa [#allocation12], 1 }
 0xad4   :  { %2213 = vsyncpa [#allocation15], 1 }
 0xad5   :  { %2214 = vsyncpa [#allocation4], 1 }

</bundles_post_ra>
